<compile_context>
chip_gen: v7x
topology: tpu7x:2x2x1
jax: 0.10.0
libtpu: 0.0.40
codegen_flags: <defaults>
</compile_context>

<pallas_src>
import functools

import jax
import jax.numpy as jnp
from jax.experimental import pallas as pl
from jax.experimental.pallas import tpu as pltpu

EPS = 1e-6


# ------------------------------ fused kernel ------------------------------

def _fused_sm_kernel(B, Cout, S, p_ref, wc_ref, bc_ref, w1_ref, b1_ref,
                     w2_ref, b2_ref, mw_ref, mb_ref,
                     match_ref, tpred_ref, fconv_ref, fflat_ref):
    # p_ref:  [Cin*9, B*2*S]  im2col patches, columns ordered (b, img, h, w)
    # wc_ref: [Cout, Cin*9]   bc_ref: [Cout, 1]
    # w1_ref: [2*Cout*S, hidden]  rows ordered (c, img, s)   b1_ref: [1, hidden]
    # w2_ref: [hidden, t_out]     b2_ref: [1, t_out]
    # mw_ref: [S, 1] (matcher weight, pre-permuted to h-major)  mb_ref: [1, 1]
    # match_ref: [1, B*S]   tpred_ref: [B, t_out]
    # fconv_ref: [Cout, B*2*S] scratch   fflat_ref: [B, 2*Cout*S] scratch
    twoS = 2 * S

    # ---- backbone: 3x3/s2 conv + ReLU for both images & batch elems, as one
    # lane-dense im2col GEMM (output long dim = B*2*S on lanes).
    acc = jnp.dot(wc_ref[...], p_ref[...], preferred_element_type=jnp.float32)
    fconv_ref[...] = jnp.maximum(acc + bc_ref[...], 0.0)        # [Cout, B*2*S]

    # ---- nn.Flatten(concat([f1, f2], dim=1)): pure layout move inside VMEM.
    # fflat[b, (c*2 + img)*S + s] = fconv[c, (b*2 + img)*S + s]
    # (W1 rows were permuted to the same (c, img, s) order in the wrapper, so
    #  each copy below is a full 128-lane unmasked row store.)
    for b in range(B):
        for c in range(Cout):
            fflat_ref[b:b + 1, c * twoS:(c + 1) * twoS] = \
                fconv_ref[c:c + 1, b * twoS:(b + 1) * twoS]

    # ---- TransformPredictorHead: Linear -> ReLU -> Linear
    h = jnp.dot(fflat_ref[...], w1_ref[...], preferred_element_type=jnp.float32)
    h = jnp.maximum(h + b1_ref[...], 0.0)
    tpred_ref[...] = (jnp.dot(h, w2_ref[...], preferred_element_type=jnp.float32)
                      + b2_ref[...])

    # ---- feature_l2_norm + correlation + ReLU + l2_norm + matcher head
    for b in range(B):                                           # B=2, unrolled
        f1 = fconv_ref[:, b * twoS:b * twoS + S]                 # [Cout, S]
        f2 = fconv_ref[:, b * twoS + S:(b + 1) * twoS]           # [Cout, S]
        n1 = jnp.sqrt(jnp.sum(f1 * f1, axis=0, keepdims=True)) + EPS
        n2 = jnp.sqrt(jnp.sum(f2 * f2, axis=0, keepdims=True)) + EPS
        f1n = f1 / n1
        f2n = f2 / n2
        # corr[s1, s2] = sum_c f1n[c, s1] * f2n[c, s2]
        corr = jax.lax.dot_general(f1n, f2n, (((0,), (0,)), ((), ())),
                                   preferred_element_type=jnp.float32)  # [S, S]
        corr = jnp.maximum(corr, 0.0)                            # F.relu
        cn = jnp.sqrt(jnp.sum(corr * corr, axis=0, keepdims=True)) + EPS  # [1,S]
        # matcher 1x1 conv as a weighted cross-sublane reduce (no M=1 matmul);
        # the l2-norm over s1 (1/cn) is folded in after the reduce.
        wsum = jnp.sum(mw_ref[...] * corr, axis=0, keepdims=True)         # [1,S]
        match_ref[0:1, b * S:(b + 1) * S] = jax.nn.sigmoid(wsum / cn + mb_ref[...])


# -------------------------------- wrapper ---------------------------------

def basic_sm_network(x1, x2, params):
    B, Cin, H, W = x1.shape
    Cout = params["conv_w"].shape[0]
    k, stride, pad = 3, 2, 1
    Ho = (H + 2 * pad - k) // stride + 1
    Wo = (W + 2 * pad - k) // stride + 1
    S = Ho * Wo
    hidden = params["t_w1"].shape[1]
    t_out = params["t_w2"].shape[1]

    # im2col for both images at once: P[Cin*9, B*2*Ho*Wo], cols = (b, img, h, w)
    xs = jnp.stack([x1, x2], axis=0)                              # [2,B,Cin,H,W]
    xp = jnp.pad(xs, ((0, 0), (0, 0), (0, 0), (pad, pad), (pad, pad)))
    taps = []
    for i in range(k):
        for j in range(k):
            taps.append(xp[:, :, :, i:i + stride * Ho:stride,
                            j:j + stride * Wo:stride])
    patches = jnp.stack(taps, axis=3)                             # [2,B,Cin,9,Ho,Wo]
    P = patches.transpose(2, 3, 1, 0, 4, 5).reshape(Cin * k * k, B * 2 * S)

    wc = params["conv_w"].reshape(Cout, Cin * k * k)              # [Cout, Cin*9]
    bc = params["conv_b"].reshape(Cout, 1)
    # permute W1 rows from flatten order (img, c, s) to kernel order (c, img, s)
    w1 = (params["t_w1"].reshape(2, Cout, S, hidden)
          .transpose(1, 0, 2, 3).reshape(2 * Cout * S, hidden))
    b1 = params["t_b1"].reshape(1, hidden)
    b2 = params["t_b2"].reshape(1, t_out)
    # einsum('bfhw,bfxy->bwhxy').view(b, h1*w1, ...) flattens f1's spatial dims
    # w-major; the kernel keeps h-major, so absorb the permutation into the
    # matcher weight (relu + s1-l2-norm are permutation invariant).
    mw = params["m_w"].reshape(Wo, Ho).T.reshape(S, 1)
    mb = params["m_b"].reshape(1, 1)

    kernel = functools.partial(_fused_sm_kernel, B, Cout, S)
    match_flat, tpred = pl.pallas_call(
        kernel,
        out_shape=(jax.ShapeDtypeStruct((1, B * S), jnp.float32),
                   jax.ShapeDtypeStruct((B, t_out), jnp.float32)),
        scratch_shapes=[pltpu.VMEM((Cout, B * 2 * S), jnp.float32),
                        pltpu.VMEM((B, 2 * Cout * S), jnp.float32)],
    )(P, wc, bc, w1, b1, params["t_w2"], b2, mw, mb)

    return match_flat.reshape(B, 1, Ho, Wo), tpred


# ------------------------ pure-JAX reference (check) ----------------------

def _l2n(f, axis):
    return f / (jnp.sqrt(jnp.sum(f * f, axis=axis, keepdims=True)) + EPS)


def reference(x1, x2, params):
    def conv_ref(x):
        y = jax.lax.conv_general_dilated(
            x, params["conv_w"], (2, 2), ((1, 1), (1, 1)),
            dimension_numbers=("NCHW", "OIHW", "NCHW"))
        return jnp.maximum(y + params["conv_b"][None, :, None, None], 0.0)

    f1, f2 = conv_ref(x1), conv_ref(x2)
    B, C, H1, W1 = f1.shape
    _, _, H2, W2 = f2.shape
    f_flat = jnp.concatenate([f1, f2], axis=1).reshape(B, -1)
    h = jnp.maximum(f_flat @ params["t_w1"] + params["t_b1"], 0.0)
    t_pred = h @ params["t_w2"] + params["t_b2"]
    f1n, f2n = _l2n(f1, 1), _l2n(f2, 1)
    corr = jnp.einsum("bfhw,bfxy->bwhxy", f1n, f2n).reshape(B, H1 * W1, H2, W2)
    corr = _l2n(jnp.maximum(corr, 0.0), 1)
    mp = jnp.einsum("bshw,s->bhw", corr, params["m_w"]) + params["m_b"][0]
    return jax.nn.sigmoid(mp)[:, None], t_pred


# --------------------------------- main -----------------------------------

if __name__ == "__main__":
    key = jax.random.PRNGKey(0)
    ks = jax.random.split(key, 9)
    B, Cin, H, W = 2, 4, 16, 16
    Cout, Ho, Wo = 8, 8, 8
    hidden, t_out = 64, 6
    S = Ho * Wo

    params = {
        "conv_w": 0.10 * jax.random.normal(ks[0], (Cout, Cin, 3, 3), jnp.float32),
        "conv_b": 0.10 * jax.random.normal(ks[1], (Cout,), jnp.float32),
        "t_w1": 0.05 * jax.random.normal(ks[2], (2 * Cout * Ho * Wo, hidden), jnp.float32),
        "t_b1": 0.05 * jax.random.normal(ks[3], (hidden,), jnp.float32),
        "t_w2": 0.05 * jax.random.normal(ks[4], (hidden, t_out), jnp.float32),
        "t_b2": 0.05 * jax.random.normal(ks[5], (t_out,), jnp.float32),
        "m_w": 0.10 * jax.random.normal(ks[6], (S,), jnp.float32),
        "m_b": jnp.zeros((1,), jnp.float32),
    }
    x1 = jax.random.normal(ks[7], (B, Cin, H, W), jnp.float32)
    x2 = jax.random.normal(ks[8], (B, Cin, H, W), jnp.float32)

    fwd = jax.jit(basic_sm_network)
    match_prob, transform_pred = jax.block_until_ready(fwd(x1, x2, params))
    mp_ref, tp_ref = reference(x1, x2, params)

    assert match_prob.shape == (B, 1, Ho, Wo)
    assert transform_pred.shape == (B, t_out)
    assert jnp.allclose(match_prob, mp_ref, atol=1e-4, rtol=1e-4)
    assert jnp.allclose(transform_pred, tp_ref, atol=1e-3, rtol=1e-3)
    print("KERNEL_OK")
</pallas_src>

<mosaic_0001>
module attributes {stable_mosaic.version = 11 : i64} {
  func.func @_fused_sm_kernel(%arg0: memref<36x256xf32, #tpu.memory_space<vmem>>, %arg1: memref<8x36xf32, #tpu.memory_space<vmem>>, %arg2: memref<8x1xf32, #tpu.memory_space<vmem>>, %arg3: memref<1024x64xf32, #tpu.memory_space<vmem>>, %arg4: memref<1x64xf32, #tpu.memory_space<vmem>>, %arg5: memref<64x6xf32, #tpu.memory_space<vmem>>, %arg6: memref<1x6xf32, #tpu.memory_space<vmem>>, %arg7: memref<64x1xf32, #tpu.memory_space<vmem>>, %arg8: memref<1x1xf32, #tpu.memory_space<vmem>>, %arg9: memref<1x128xf32, #tpu.memory_space<vmem>>, %arg10: memref<2x6xf32, #tpu.memory_space<vmem>>, %arg11: memref<8x256xf32, #tpu.memory_space<vmem>>, %arg12: memref<2x1024xf32, #tpu.memory_space<vmem>>) attributes {dimension_semantics = [], scalar_prefetch = 0 : i64, scratch_operands = 2 : i64, tpu.core_type = #tpu.core_type<tc>} {
    %c0 = arith.constant 0 : index
    %c0_0 = arith.constant 0 : index
    %0 = vector.load %arg1[%c0, %c0_0] : memref<8x36xf32, #tpu.memory_space<vmem>>, vector<8x36xf32>
    %c0_1 = arith.constant 0 : index
    %c0_2 = arith.constant 0 : index
    %1 = vector.load %arg0[%c0_1, %c0_2] : memref<36x256xf32, #tpu.memory_space<vmem>>, vector<36x256xf32>
    %cst = arith.constant dense<0.000000e+00> : vector<8x256xf32>
    %2 = tpu.matmul %0, %1, %cst {dimension_numbers = #tpu.dot_dimension_numbers<[1], [0], [0], [1], [0, 0, 1, 1], [], []>} : vector<8x36xf32>, vector<36x256xf32>, vector<8x256xf32> -> vector<8x256xf32>
    %c0_3 = arith.constant 0 : index
    %c0_4 = arith.constant 0 : index
    %3 = vector.load %arg2[%c0_3, %c0_4] : memref<8x1xf32, #tpu.memory_space<vmem>>, vector<8x1xf32>
    %4 = vector.broadcast %3 : vector<8x1xf32> to vector<8x256xf32>
    %5 = arith.addf %2, %4 : vector<8x256xf32>
    %cst_5 = arith.constant 0.000000e+00 : f32
    %6 = vector.broadcast %cst_5 : f32 to vector<8x256xf32>
    %7 = arith.maximumf %5, %6 : vector<8x256xf32>
    %c0_6 = arith.constant 0 : index
    %c0_7 = arith.constant 0 : index
    %8 = vector.load %arg11[%c0_6, %c0_7] : memref<8x256xf32, #tpu.memory_space<vmem>>, vector<8x256xf32>
    tpu.vector_store %arg11[%c0_6, %c0_7], %7 {strides = array<i32>} : memref<8x256xf32, #tpu.memory_space<vmem>>, vector<8x256xf32>,
    %c0_8 = arith.constant 0 : index
    %c0_9 = arith.constant 0 : index
    %9 = vector.load %arg11[%c0_8, %c0_9] : memref<8x256xf32, #tpu.memory_space<vmem>>, vector<1x128xf32>
    %c0_10 = arith.constant 0 : index
    %c0_11 = arith.constant 0 : index
    %10 = vector.load %arg12[%c0_10, %c0_11] : memref<2x1024xf32, #tpu.memory_space<vmem>>, vector<1x128xf32>
    tpu.vector_store %arg12[%c0_10, %c0_11], %9 {strides = array<i32>} : memref<2x1024xf32, #tpu.memory_space<vmem>>, vector<1x128xf32>,
    %c1 = arith.constant 1 : index
    %c0_12 = arith.constant 0 : index
    %11 = vector.load %arg11[%c1, %c0_12] : memref<8x256xf32, #tpu.memory_space<vmem>>, vector<1x128xf32>
    %c0_13 = arith.constant 0 : index
    %c128 = arith.constant 128 : index
    %12 = vector.load %arg12[%c0_13, %c128] : memref<2x1024xf32, #tpu.memory_space<vmem>>, vector<1x128xf32>
    tpu.vector_store %arg12[%c0_13, %c128], %11 {strides = array<i32>} : memref<2x1024xf32, #tpu.memory_space<vmem>>, vector<1x128xf32>,
    %c2 = arith.constant 2 : index
    %c0_14 = arith.constant 0 : index
    %13 = vector.load %arg11[%c2, %c0_14] : memref<8x256xf32, #tpu.memory_space<vmem>>, vector<1x128xf32>
    %c0_15 = arith.constant 0 : index
    %c256 = arith.constant 256 : index
    %14 = vector.load %arg12[%c0_15, %c256] : memref<2x1024xf32, #tpu.memory_space<vmem>>, vector<1x128xf32>
    tpu.vector_store %arg12[%c0_15, %c256], %13 {strides = array<i32>} : memref<2x1024xf32, #tpu.memory_space<vmem>>, vector<1x128xf32>,
    %c3 = arith.constant 3 : index
    %c0_16 = arith.constant 0 : index
    %15 = vector.load %arg11[%c3, %c0_16] : memref<8x256xf32, #tpu.memory_space<vmem>>, vector<1x128xf32>
    %c0_17 = arith.constant 0 : index
    %c384 = arith.constant 384 : index
    %16 = vector.load %arg12[%c0_17, %c384] : memref<2x1024xf32, #tpu.memory_space<vmem>>, vector<1x128xf32>
    tpu.vector_store %arg12[%c0_17, %c384], %15 {strides = array<i32>} : memref<2x1024xf32, #tpu.memory_space<vmem>>, vector<1x128xf32>,
    %c4 = arith.constant 4 : index
    %c0_18 = arith.constant 0 : index
    %17 = vector.load %arg11[%c4, %c0_18] : memref<8x256xf32, #tpu.memory_space<vmem>>, vector<1x128xf32>
    %c0_19 = arith.constant 0 : index
    %c512 = arith.constant 512 : index
    %18 = vector.load %arg12[%c0_19, %c512] : memref<2x1024xf32, #tpu.memory_space<vmem>>, vector<1x128xf32>
    tpu.vector_store %arg12[%c0_19, %c512], %17 {strides = array<i32>} : memref<2x1024xf32, #tpu.memory_space<vmem>>, vector<1x128xf32>,
    %c5 = arith.constant 5 : index
    %c0_20 = arith.constant 0 : index
    %19 = vector.load %arg11[%c5, %c0_20] : memref<8x256xf32, #tpu.memory_space<vmem>>, vector<1x128xf32>
    %c0_21 = arith.constant 0 : index
    %c640 = arith.constant 640 : index
    %20 = vector.load %arg12[%c0_21, %c640] : memref<2x1024xf32, #tpu.memory_space<vmem>>, vector<1x128xf32>
    tpu.vector_store %arg12[%c0_21, %c640], %19 {strides = array<i32>} : memref<2x1024xf32, #tpu.memory_space<vmem>>, vector<1x128xf32>,
    %c6 = arith.constant 6 : index
    %c0_22 = arith.constant 0 : index
    %21 = vector.load %arg11[%c6, %c0_22] : memref<8x256xf32, #tpu.memory_space<vmem>>, vector<1x128xf32>
    %c0_23 = arith.constant 0 : index
    %c768 = arith.constant 768 : index
    %22 = vector.load %arg12[%c0_23, %c768] : memref<2x1024xf32, #tpu.memory_space<vmem>>, vector<1x128xf32>
    tpu.vector_store %arg12[%c0_23, %c768], %21 {strides = array<i32>} : memref<2x1024xf32, #tpu.memory_space<vmem>>, vector<1x128xf32>,
    %c7 = arith.constant 7 : index
    %c0_24 = arith.constant 0 : index
    %23 = vector.load %arg11[%c7, %c0_24] : memref<8x256xf32, #tpu.memory_space<vmem>>, vector<1x128xf32>
    %c0_25 = arith.constant 0 : index
    %c896 = arith.constant 896 : index
    %24 = vector.load %arg12[%c0_25, %c896] : memref<2x1024xf32, #tpu.memory_space<vmem>>, vector<1x128xf32>
    tpu.vector_store %arg12[%c0_25, %c896], %23 {strides = array<i32>} : memref<2x1024xf32, #tpu.memory_space<vmem>>, vector<1x128xf32>,
    %c0_26 = arith.constant 0 : index
    %c128_27 = arith.constant 128 : index
    %25 = vector.load %arg11[%c0_26, %c128_27] : memref<8x256xf32, #tpu.memory_space<vmem>>, vector<1x128xf32>
    %c1_28 = arith.constant 1 : index
    %c0_29 = arith.constant 0 : index
    %26 = vector.load %arg12[%c1_28, %c0_29] : memref<2x1024xf32, #tpu.memory_space<vmem>>, vector<1x128xf32>
    tpu.vector_store %arg12[%c1_28, %c0_29], %25 {strides = array<i32>} : memref<2x1024xf32, #tpu.memory_space<vmem>>, vector<1x128xf32>,
    %c1_30 = arith.constant 1 : index
    %c128_31 = arith.constant 128 : index
    %27 = vector.load %arg11[%c1_30, %c128_31] : memref<8x256xf32, #tpu.memory_space<vmem>>, vector<1x128xf32>
    %c1_32 = arith.constant 1 : index
    %c128_33 = arith.constant 128 : index
    %28 = vector.load %arg12[%c1_32, %c128_33] : memref<2x1024xf32, #tpu.memory_space<vmem>>, vector<1x128xf32>
    tpu.vector_store %arg12[%c1_32, %c128_33], %27 {strides = array<i32>} : memref<2x1024xf32, #tpu.memory_space<vmem>>, vector<1x128xf32>,
    %c2_34 = arith.constant 2 : index
    %c128_35 = arith.constant 128 : index
    %29 = vector.load %arg11[%c2_34, %c128_35] : memref<8x256xf32, #tpu.memory_space<vmem>>, vector<1x128xf32>
    %c1_36 = arith.constant 1 : index
    %c256_37 = arith.constant 256 : index
    %30 = vector.load %arg12[%c1_36, %c256_37] : memref<2x1024xf32, #tpu.memory_space<vmem>>, vector<1x128xf32>
    tpu.vector_store %arg12[%c1_36, %c256_37], %29 {strides = array<i32>} : memref<2x1024xf32, #tpu.memory_space<vmem>>, vector<1x128xf32>,
    %c3_38 = arith.constant 3 : index
    %c128_39 = arith.constant 128 : index
    %31 = vector.load %arg11[%c3_38, %c128_39] : memref<8x256xf32, #tpu.memory_space<vmem>>, vector<1x128xf32>
    %c1_40 = arith.constant 1 : index
    %c384_41 = arith.constant 384 : index
    %32 = vector.load %arg12[%c1_40, %c384_41] : memref<2x1024xf32, #tpu.memory_space<vmem>>, vector<1x128xf32>
    tpu.vector_store %arg12[%c1_40, %c384_41], %31 {strides = array<i32>} : memref<2x1024xf32, #tpu.memory_space<vmem>>, vector<1x128xf32>,
    %c4_42 = arith.constant 4 : index
    %c128_43 = arith.constant 128 : index
    %33 = vector.load %arg11[%c4_42, %c128_43] : memref<8x256xf32, #tpu.memory_space<vmem>>, vector<1x128xf32>
    %c1_44 = arith.constant 1 : index
    %c512_45 = arith.constant 512 : index
    %34 = vector.load %arg12[%c1_44, %c512_45] : memref<2x1024xf32, #tpu.memory_space<vmem>>, vector<1x128xf32>
    tpu.vector_store %arg12[%c1_44, %c512_45], %33 {strides = array<i32>} : memref<2x1024xf32, #tpu.memory_space<vmem>>, vector<1x128xf32>,
    %c5_46 = arith.constant 5 : index
    %c128_47 = arith.constant 128 : index
    %35 = vector.load %arg11[%c5_46, %c128_47] : memref<8x256xf32, #tpu.memory_space<vmem>>, vector<1x128xf32>
    %c1_48 = arith.constant 1 : index
    %c640_49 = arith.constant 640 : index
    %36 = vector.load %arg12[%c1_48, %c640_49] : memref<2x1024xf32, #tpu.memory_space<vmem>>, vector<1x128xf32>
    tpu.vector_store %arg12[%c1_48, %c640_49], %35 {strides = array<i32>} : memref<2x1024xf32, #tpu.memory_space<vmem>>, vector<1x128xf32>,
    %c6_50 = arith.constant 6 : index
    %c128_51 = arith.constant 128 : index
    %37 = vector.load %arg11[%c6_50, %c128_51] : memref<8x256xf32, #tpu.memory_space<vmem>>, vector<1x128xf32>
    %c1_52 = arith.constant 1 : index
    %c768_53 = arith.constant 768 : index
    %38 = vector.load %arg12[%c1_52, %c768_53] : memref<2x1024xf32, #tpu.memory_space<vmem>>, vector<1x128xf32>
    tpu.vector_store %arg12[%c1_52, %c768_53], %37 {strides = array<i32>} : memref<2x1024xf32, #tpu.memory_space<vmem>>, vector<1x128xf32>,
    %c7_54 = arith.constant 7 : index
    %c128_55 = arith.constant 128 : index
    %39 = vector.load %arg11[%c7_54, %c128_55] : memref<8x256xf32, #tpu.memory_space<vmem>>, vector<1x128xf32>
    %c1_56 = arith.constant 1 : index
    %c896_57 = arith.constant 896 : index
    %40 = vector.load %arg12[%c1_56, %c896_57] : memref<2x1024xf32, #tpu.memory_space<vmem>>, vector<1x128xf32>
    tpu.vector_store %arg12[%c1_56, %c896_57], %39 {strides = array<i32>} : memref<2x1024xf32, #tpu.memory_space<vmem>>, vector<1x128xf32>,
    %c0_58 = arith.constant 0 : index
    %c0_59 = arith.constant 0 : index
    %41 = vector.load %arg12[%c0_58, %c0_59] : memref<2x1024xf32, #tpu.memory_space<vmem>>, vector<2x1024xf32>
    %c0_60 = arith.constant 0 : index
    %c0_61 = arith.constant 0 : index
    %42 = vector.load %arg3[%c0_60, %c0_61] : memref<1024x64xf32, #tpu.memory_space<vmem>>, vector<1024x64xf32>
    %cst_62 = arith.constant dense<0.000000e+00> : vector<2x64xf32>
    %43 = tpu.matmul %41, %42, %cst_62 {dimension_numbers = #tpu.dot_dimension_numbers<[1], [0], [0], [1], [0, 0, 1, 1], [], []>} : vector<2x1024xf32>, vector<1024x64xf32>, vector<2x64xf32> -> vector<2x64xf32>
    %c0_63 = arith.constant 0 : index
    %c0_64 = arith.constant 0 : index
    %44 = vector.load %arg4[%c0_63, %c0_64] : memref<1x64xf32, #tpu.memory_space<vmem>>, vector<1x64xf32>
    %45 = vector.broadcast %44 : vector<1x64xf32> to vector<2x64xf32>
    %46 = arith.addf %43, %45 : vector<2x64xf32>
    %cst_65 = arith.constant 0.000000e+00 : f32
    %47 = vector.broadcast %cst_65 : f32 to vector<2x64xf32>
    %48 = arith.maximumf %46, %47 : vector<2x64xf32>
    %c0_66 = arith.constant 0 : index
    %c0_67 = arith.constant 0 : index
    %49 = vector.load %arg5[%c0_66, %c0_67] : memref<64x6xf32, #tpu.memory_space<vmem>>, vector<64x6xf32>
    %cst_68 = arith.constant dense<0.000000e+00> : vector<2x6xf32>
    %50 = tpu.matmul %48, %49, %cst_68 {dimension_numbers = #tpu.dot_dimension_numbers<[1], [0], [0], [1], [0, 0, 1, 1], [], []>} : vector<2x64xf32>, vector<64x6xf32>, vector<2x6xf32> -> vector<2x6xf32>
    %c0_69 = arith.constant 0 : index
    %c0_70 = arith.constant 0 : index
    %51 = vector.load %arg6[%c0_69, %c0_70] : memref<1x6xf32, #tpu.memory_space<vmem>>, vector<1x6xf32>
    %52 = vector.broadcast %51 : vector<1x6xf32> to vector<2x6xf32>
    %53 = arith.addf %50, %52 : vector<2x6xf32>
    %c0_71 = arith.constant 0 : index
    %c0_72 = arith.constant 0 : index
    %54 = vector.load %arg10[%c0_71, %c0_72] : memref<2x6xf32, #tpu.memory_space<vmem>>, vector<2x6xf32>
    tpu.vector_store %arg10[%c0_71, %c0_72], %53 {strides = array<i32>} : memref<2x6xf32, #tpu.memory_space<vmem>>, vector<2x6xf32>,
    %c0_73 = arith.constant 0 : index
    %c0_74 = arith.constant 0 : index
    %55 = vector.load %arg11[%c0_73, %c0_74] : memref<8x256xf32, #tpu.memory_space<vmem>>, vector<8x64xf32>
    %c0_75 = arith.constant 0 : index
    %c64 = arith.constant 64 : index
    %56 = vector.load %arg11[%c0_75, %c64] : memref<8x256xf32, #tpu.memory_space<vmem>>, vector<8x64xf32>
    %57 = arith.mulf %55, %55 : vector<8x64xf32>
    %cst_76 = arith.constant dense<0.000000e+00> : vector<64xf32>
    %58 = vector.multi_reduction <add>, %57, %cst_76 [0] : vector<8x64xf32> to vector<64xf32>
    %59 = vector.shape_cast %58 : vector<64xf32> to vector<1x64xf32>
    %60 = math.sqrt %59 : vector<1x64xf32>
    %cst_77 = arith.constant 9.99999997E-7 : f32
    %61 = vector.broadcast %cst_77 : f32 to vector<1x64xf32>
    %62 = arith.addf %60, %61 : vector<1x64xf32>
    %63 = arith.mulf %56, %56 : vector<8x64xf32>
    %cst_78 = arith.constant dense<0.000000e+00> : vector<64xf32>
    %64 = vector.multi_reduction <add>, %63, %cst_78 [0] : vector<8x64xf32> to vector<64xf32>
    %65 = vector.shape_cast %64 : vector<64xf32> to vector<1x64xf32>
    %66 = math.sqrt %65 : vector<1x64xf32>
    %cst_79 = arith.constant 9.99999997E-7 : f32
    %67 = vector.broadcast %cst_79 : f32 to vector<1x64xf32>
    %68 = arith.addf %66, %67 : vector<1x64xf32>
    %69 = vector.broadcast %62 : vector<1x64xf32> to vector<8x64xf32>
    %70 = arith.divf %55, %69 : vector<8x64xf32>
    %71 = vector.broadcast %68 : vector<1x64xf32> to vector<8x64xf32>
    %72 = arith.divf %56, %71 : vector<8x64xf32>
    %cst_80 = arith.constant dense<0.000000e+00> : vector<64x64xf32>
    %73 = tpu.matmul %70, %72, %cst_80 {dimension_numbers = #tpu.dot_dimension_numbers<[0], [0], [1], [1], [0, 1, 1, 1], [], []>} : vector<8x64xf32>, vector<8x64xf32>, vector<64x64xf32> -> vector<64x64xf32>
    %cst_81 = arith.constant 0.000000e+00 : f32
    %74 = vector.broadcast %cst_81 : f32 to vector<64x64xf32>
    %75 = arith.maximumf %73, %74 : vector<64x64xf32>
    %76 = arith.mulf %75, %75 : vector<64x64xf32>
    %cst_82 = arith.constant dense<0.000000e+00> : vector<64xf32>
    %77 = vector.multi_reduction <add>, %76, %cst_82 [0] : vector<64x64xf32> to vector<64xf32>
    %78 = vector.shape_cast %77 : vector<64xf32> to vector<1x64xf32>
    %79 = math.sqrt %78 : vector<1x64xf32>
    %cst_83 = arith.constant 9.99999997E-7 : f32
    %80 = vector.broadcast %cst_83 : f32 to vector<1x64xf32>
    %81 = arith.addf %79, %80 : vector<1x64xf32>
    %c0_84 = arith.constant 0 : index
    %c0_85 = arith.constant 0 : index
    %82 = vector.load %arg7[%c0_84, %c0_85] : memref<64x1xf32, #tpu.memory_space<vmem>>, vector<64x1xf32>
    %83 = vector.broadcast %82 : vector<64x1xf32> to vector<64x64xf32>
    %84 = arith.mulf %83, %75 : vector<64x64xf32>
    %cst_86 = arith.constant dense<0.000000e+00> : vector<64xf32>
    %85 = vector.multi_reduction <add>, %84, %cst_86 [0] : vector<64x64xf32> to vector<64xf32>
    %86 = vector.shape_cast %85 : vector<64xf32> to vector<1x64xf32>
    %87 = arith.divf %86, %81 : vector<1x64xf32>
    %c0_87 = arith.constant 0 : index
    %c0_88 = arith.constant 0 : index
    %88 = vector.load %arg8[%c0_87, %c0_88] : memref<1x1xf32, #tpu.memory_space<vmem>>, vector<1x1xf32>
    %89 = vector.broadcast %88 : vector<1x1xf32> to vector<1x64xf32>
    %90 = arith.addf %87, %89 : vector<1x64xf32>
    %91 = arith.negf %90 : vector<1x64xf32>
    %92 = math.exp %91 : vector<1x64xf32>
    %cst_89 = arith.constant 1.000000e+00 : f32
    %93 = vector.broadcast %cst_89 : f32 to vector<1x64xf32>
    %94 = arith.addf %93, %92 : vector<1x64xf32>
    %95 = arith.divf %93, %94 : vector<1x64xf32>
    %c0_90 = arith.constant 0 : index
    %c0_91 = arith.constant 0 : index
    %96 = vector.load %arg9[%c0_90, %c0_91] : memref<1x128xf32, #tpu.memory_space<vmem>>, vector<1x64xf32>
    tpu.vector_store %arg9[%c0_90, %c0_91], %95 {strides = array<i32>} : memref<1x128xf32, #tpu.memory_space<vmem>>, vector<1x64xf32>,
    %c0_92 = arith.constant 0 : index
    %c128_93 = arith.constant 128 : index
    %97 = vector.load %arg11[%c0_92, %c128_93] : memref<8x256xf32, #tpu.memory_space<vmem>>, vector<8x64xf32>
    %c0_94 = arith.constant 0 : index
    %c192 = arith.constant 192 : index
    %98 = vector.load %arg11[%c0_94, %c192] : memref<8x256xf32, #tpu.memory_space<vmem>>, vector<8x64xf32>
    %99 = arith.mulf %97, %97 : vector<8x64xf32>
    %cst_95 = arith.constant dense<0.000000e+00> : vector<64xf32>
    %100 = vector.multi_reduction <add>, %99, %cst_95 [0] : vector<8x64xf32> to vector<64xf32>
    %101 = vector.shape_cast %100 : vector<64xf32> to vector<1x64xf32>
    %102 = math.sqrt %101 : vector<1x64xf32>
    %cst_96 = arith.constant 9.99999997E-7 : f32
    %103 = vector.broadcast %cst_96 : f32 to vector<1x64xf32>
    %104 = arith.addf %102, %103 : vector<1x64xf32>
    %105 = arith.mulf %98, %98 : vector<8x64xf32>
    %cst_97 = arith.constant dense<0.000000e+00> : vector<64xf32>
    %106 = vector.multi_reduction <add>, %105, %cst_97 [0] : vector<8x64xf32> to vector<64xf32>
    %107 = vector.shape_cast %106 : vector<64xf32> to vector<1x64xf32>
    %108 = math.sqrt %107 : vector<1x64xf32>
    %cst_98 = arith.constant 9.99999997E-7 : f32
    %109 = vector.broadcast %cst_98 : f32 to vector<1x64xf32>
    %110 = arith.addf %108, %109 : vector<1x64xf32>
    %111 = vector.broadcast %104 : vector<1x64xf32> to vector<8x64xf32>
    %112 = arith.divf %97, %111 : vector<8x64xf32>
    %113 = vector.broadcast %110 : vector<1x64xf32> to vector<8x64xf32>
    %114 = arith.divf %98, %113 : vector<8x64xf32>
    %cst_99 = arith.constant dense<0.000000e+00> : vector<64x64xf32>
    %115 = tpu.matmul %112, %114, %cst_99 {dimension_numbers = #tpu.dot_dimension_numbers<[0], [0], [1], [1], [0, 1, 1, 1], [], []>} : vector<8x64xf32>, vector<8x64xf32>, vector<64x64xf32> -> vector<64x64xf32>
    %cst_100 = arith.constant 0.000000e+00 : f32
    %116 = vector.broadcast %cst_100 : f32 to vector<64x64xf32>
    %117 = arith.maximumf %115, %116 : vector<64x64xf32>
    %118 = arith.mulf %117, %117 : vector<64x64xf32>
    %cst_101 = arith.constant dense<0.000000e+00> : vector<64xf32>
    %119 = vector.multi_reduction <add>, %118, %cst_101 [0] : vector<64x64xf32> to vector<64xf32>
    %120 = vector.shape_cast %119 : vector<64xf32> to vector<1x64xf32>
    %121 = math.sqrt %120 : vector<1x64xf32>
    %cst_102 = arith.constant 9.99999997E-7 : f32
    %122 = vector.broadcast %cst_102 : f32 to vector<1x64xf32>
    %123 = arith.addf %121, %122 : vector<1x64xf32>
    %c0_103 = arith.constant 0 : index
    %c0_104 = arith.constant 0 : index
    %124 = vector.load %arg7[%c0_103, %c0_104] : memref<64x1xf32, #tpu.memory_space<vmem>>, vector<64x1xf32>
    %125 = vector.broadcast %124 : vector<64x1xf32> to vector<64x64xf32>
    %126 = arith.mulf %125, %117 : vector<64x64xf32>
    %cst_105 = arith.constant dense<0.000000e+00> : vector<64xf32>
    %127 = vector.multi_reduction <add>, %126, %cst_105 [0] : vector<64x64xf32> to vector<64xf32>
    %128 = vector.shape_cast %127 : vector<64xf32> to vector<1x64xf32>
    %129 = arith.divf %128, %123 : vector<1x64xf32>
    %c0_106 = arith.constant 0 : index
    %c0_107 = arith.constant 0 : index
    %130 = vector.load %arg8[%c0_106, %c0_107] : memref<1x1xf32, #tpu.memory_space<vmem>>, vector<1x1xf32>
    %131 = vector.broadcast %130 : vector<1x1xf32> to vector<1x64xf32>
    %132 = arith.addf %129, %131 : vector<1x64xf32>
    %133 = arith.negf %132 : vector<1x64xf32>
    %134 = math.exp %133 : vector<1x64xf32>
    %cst_108 = arith.constant 1.000000e+00 : f32
    %135 = vector.broadcast %cst_108 : f32 to vector<1x64xf32>
    %136 = arith.addf %135, %134 : vector<1x64xf32>
    %137 = arith.divf %135, %136 : vector<1x64xf32>
    %c0_109 = arith.constant 0 : index
    %c64_110 = arith.constant 64 : index
    %138 = vector.load %arg9[%c0_109, %c64_110] : memref<1x128xf32, #tpu.memory_space<vmem>>, vector<1x64xf32>
    tpu.vector_store %arg9[%c0_109, %c64_110], %137 {strides = array<i32>} : memref<1x128xf32, #tpu.memory_space<vmem>>, vector<1x64xf32>,
    return
  }
}

</mosaic_0001>

<bundles_post_ra>
// kernel: basic_sm_network.1
= control target key start
LH: loop header
LB: loop body
LE: loop exit
PB: predicated region body
PF: predicated region fallthrough
CT: control target
= control target key end

     0   :  { %s2639_s0 = inlined_call_operand.vmem [shape: f32[36,256], index: 0, kind: input, shape index: {}]   ;;  %s2640_s1 = inlined_call_operand.vmem [shape: f32[8,36], index: 1, kind: input, shape index: {}]   ;;  %s2641_s2 = inlined_call_operand.vmem [shape: f32[8,1], index: 2, kind: input, shape index: {}]   ;;  %s2642_s3 = inlined_call_operand.vmem [shape: f32[1024,64], index: 3, kind: input, shape index: {}]   ;;  %s2643_s4 = inlined_call_operand.vmem [shape: f32[1,64], index: 4, kind: input, shape index: {}]   ;;  %s2644_s5 = inlined_call_operand.vmem [shape: f32[64,6], index: 5, kind: input, shape index: {}]   ;;  %s2645_s6 = inlined_call_operand.vmem [shape: f32[1,6], index: 6, kind: input, shape index: {}]   ;;  %s2646_s7 = inlined_call_operand.vmem [shape: f32[64,1], index: 7, kind: input, shape index: {}]   ;;  %s2647_s8 = inlined_call_operand.<no memory space> [shape: f32[1,1], index: 8, kind: input, shape index: {}]   ;;  %s2648_s9 = inlined_call_operand.vmem [shape: f32[1,128], index: 9, kind: output, shape index: {0}]   ;;  %s2649_s10 = inlined_call_operand.hbm [shape: f32[2,6], index: 10, kind: output, shape index: {1}]  }
   0x1   :  { %v16_v0 = vstv %s2647_s8 }
   0x2   :  { %17 = vst [vmem:[#allocation4] sm:$0x1] %v16_v0 }
   0x3   :  { %v39_v1 = vld [vmem:[%s2639_s0 + $0x8] sm:$0xff]  ;;  %v41_v2 = vld [vmem:[%s2639_s0 + $0x18] sm:$0xff]  ;;  %v38_v3 = vld [vmem:[%s2639_s0] sm:$0xff]  ;;  %v1890_v8 = vmov 0.0   ;;  %v1891_v13 = vmov 0   ;;  %vm58_vm0 = vcmask 1043456  }
   0x4   :  { %v1675_v4 = vpack.c.bf16 %v41_v2, %v39_v1  ;;  %v40_v5 = vld [vmem:[%s2639_s0 + $0x10] sm:$0xff]  ;;  %v43_v6 = vld [vmem:[%s2639_s0 + $0x28] sm:$0xff]  ;;  %v45_v7 = vld [vmem:[%s2639_s0 + $0x38] sm:$0xff]  ;;  %129 = vmatprep.mubr.f32.mxu0 %v1890_v8  ;;  %1830 = vset.pattern.permute.xlu0 %v1891_v13 }
   0x5   :  { %v1677_v9 = vpack.c.bf16 %v40_v5, %v38_v3  ;;  %v1679_v10 = vpack.c.bf16 %v45_v7, %v43_v6  ;;  %v42_v11 = vld [vmem:[%s2639_s0 + $0x20] sm:$0xff]  ;;  %v44_v12 = vld [vmem:[%s2639_s0 + $0x30] sm:$0xff]  ;;  %v47_v16 = vld [vmem:[%s2639_s0 + $0x48] sm:$0xf] }
   0x6   :  { %1676 = vmatprep.subr.bf16.mxu0 %v1675_v4  ;;  %v48_v14 = vld [vmem:[%s2641_s2] sm:$0xff]  ;;  %v1681_v15 = vpack.c.bf16 %v44_v12, %v42_v11  ;;  %v191_v18 = vld [vmem:[%s2642_s3 + $0x88] sm:$0xff]  ;;  %v192_v27 = vld [vmem:[%s2642_s3 + $0x90] sm:$0xff] }
   0x7   :  { %1678 = vmatpush1.bf16.msra.mxu0 %v1677_v9  ;;  %51 = vperm.xlu0 %1830, %v48_v14   ;;  %v190_v17 = vld [vmem:[%s2642_s3 + $0x80] sm:$0xff]  ;;  %v175_v21 = vld [vmem:[%s2642_s3 + $0x8] sm:$0xff]  ;;  %v193_v28 = vld [vmem:[%s2642_s3 + $0x98] sm:$0xff] }
   0x8   :  { %v174_v19 = vld [vmem:[%s2642_s3] sm:$0xff]  ;;  %1680 = vmatprep.subr.bf16.mxu0 %v1679_v10  ;;  %v1683_v20 = vpack.c.bf16 %v191_v18, %v190_v17  ;;  %v223_v23 = vld [vmem:[%s2642_s3 + $0x188] sm:$0xff]  ;;  %v176_v29 = vld [vmem:[%s2642_s3 + $0x10] sm:$0xff]  ;;  %v1687_v31 = vpack.c.bf16 %v193_v28, %v192_v27 }
   0x9   :  { %v222_v22 = vld [vmem:[%s2642_s3 + $0x180] sm:$0xff]  ;;  %v1685_v24 = vpack.c.bf16 %v175_v21, %v174_v19  ;;  %v207_v26 = vld [vmem:[%s2642_s3 + $0x108] sm:$0xff]  ;;  %v177_v30 = vld [vmem:[%s2642_s3 + $0x18] sm:$0xff] }
   0xa   :  { %v206_v25 = vld [vmem:[%s2642_s3 + $0x100] sm:$0xff]  ;;  %1684 = vmatprep.subr.bf16.mxu1 %v1683_v20  ;;  %v1689_v32 = vpack.c.bf16 %v177_v30, %v176_v29 }
   0xb   :  { %1682 = vmatpush1.bf16.msra.mxu0 %v1681_v15  ;;  %1686 = vmatpush3.bf16.msra.mxu1 %v1685_v24 }
   0xc   :  { %18 = vsyncpa [#allocation6], 0  ;;  %1437 = vmatprep.subr.msk.mxu0 %vm58_vm0, %v47_v16  ;;  %v46_v33 = vld [vmem:[%s2639_s0 + $0x40] sm:$0xf]  ;;  %v1715_v34 = vpack.c.bf16 %v223_v23, %v222_v22  ;;  %vm54_vm1 = vcmask 293888   ;;  %v1717_v36 = vpack.c.bf16 %v207_v26, %v206_v25  ;;  %1688 = vmatprep.subr.bf16.mxu1 %v1687_v31  ;;  %v224_v37 = vld [vmem:[%s2642_s3 + $0x190] sm:$0xff] }
   0xd   :  { %v37_v35 = vld [vmem:[%s2640_s1] sm:$0xff]  ;;  %v225_v38 = vld [vmem:[%s2642_s3 + $0x198] sm:$0xff]  ;;  %v208_v40 = vld [vmem:[%s2642_s3 + $0x110] sm:$0xff]  ;;  %vm649_vm2 = vcmask 523264   ;;  %vm742_vm3 = vcmask 1048064   ;;  %s1893_s12 = smov 64  }
   0xe   :  { %v1719_v39 = vpack.c.bf16 %v225_v38, %v224_v37  ;;  %v209_v41 = vld [vmem:[%s2642_s3 + $0x118] sm:$0xff]  ;;  %v194_v43 = vld [vmem:[%s2642_s3 + $0xa0] sm:$0xff]  ;;  %v195_v44 = vld [vmem:[%s2642_s3 + $0xa8] sm:$0xff]  ;;  %vm1895_vm12 = vmmov 0   ;;  %vm798_vm13 = vcmask 64512   ;;  %s1896_s21 = smov [#allocation5]  }
   0xf   :  { %1438 = vmatpush1.msk.msra.mxu0 %vm58_vm0, %v46_v33  ;;  %1690 = vmatpush3.bf16.msra.mxu1 %v1689_v32  ;;  %v1721_v42 = vpack.c.bf16 %v209_v41, %v208_v40  ;;  %v1691_v45 = vpack.c.bf16 %v195_v44, %v194_v43  ;;  %v178_v46 = vld [vmem:[%s2642_s3 + $0x20] sm:$0xff]  ;;  %v179_v47 = vld [vmem:[%s2642_s3 + $0x28] sm:$0xff]  ;;  %v196_v55 = vld [vmem:[%s2642_s3 + $0xb0] sm:$0xff]  ;;  %vm723_vm0 = vcmask 41984   ;;  %s1427_s0 = sshll.u32 %s1896_s21, 4  ;;  %s1428_s0 = int_to_ptr.vmem [resolvable:$true] %s1427_s0 }
  0x10   :  { %1439 = vmatmul.mubr.msk.f32.vlgmr.msra.gmra.mrb[0].mxu0 %vm54_vm1, %v37_v35  ;;  %1716 = vmatprep.subr.bf16.mxu0 %v1715_v34  ;;  %v1693_v48 = vpack.c.bf16 %v179_v47, %v178_v46  ;;  %v226_v49 = vld [vmem:[%s2642_s3 + $0x1a0] sm:$0xff]  ;;  %v227_v50 = vld [vmem:[%s2642_s3 + $0x1a8] sm:$0xff]  ;;  %v197_v56 = vld [vmem:[%s2642_s3 + $0xb8] sm:$0xff]  ;;  %vm1069_vm1 = vcmask 516096   ;;  %s1866_s1 = scalar_lea.vmem %s1428_s0, 32  ;;  %p1871_p1 = scmp.lt.s32.totalorder %s1428_s0, %s1428_s0 }
  0x11   :  { %1718 = vmatpush3.bf16.msra.mxu0 %v1717_v36  ;;  %1692 = vmatprep.subr.bf16.mxu1 %v1691_v45  ;;  %v1723_v51 = vpack.c.bf16 %v227_v50, %v226_v49  ;;  %v210_v52 = vld [vmem:[%s2642_s3 + $0x120] sm:$0xff]  ;;  %v211_v53 = vld [vmem:[%s2642_s3 + $0x128] sm:$0xff]  ;;  %v1695_v57 = vpack.c.bf16 %v197_v56, %v196_v55  ;;  %v180_v58 = vld [vmem:[%s2642_s3 + $0x30] sm:$0xff]  ;;  %p1867_p0 = scmp.ne.s32.totalorder %s1428_s0, %s1866_s1  ;;  %p1872_p2 = scmp.lt.s32.totalorder %s1866_s1, %s1866_s1 }
  0x12   :  { %1720 = vmatprep.subr.bf16.mxu0 %v1719_v39  ;;  %v1725_v54 = vpack.c.bf16 %v211_v53, %v210_v52  ;;  %v181_v59 = vld [vmem:[%s2642_s3 + $0x38] sm:$0xff]  ;;  %v228_v61 = vld [vmem:[%s2642_s3 + $0x1b0] sm:$0xff]  ;;  %v198_v3 = vld [vmem:[%s2642_s3 + $0xc0] sm:$0xff] }
  0x13   :  { %1694 = vmatpush3.bf16.msra.mxu1 %v1693_v48  ;;  %v1697_v60 = vpack.c.bf16 %v181_v59, %v180_v58  ;;  %v229_v62 = vld [vmem:[%s2642_s3 + $0x1b8] sm:$0xff]  ;;  %v212_v0 = vld [vmem:[%s2642_s3 + $0x130] sm:$0xff]  ;;  %v199_v4 = vld [vmem:[%s2642_s3 + $0xc8] sm:$0xff]  ;;  %p1873_p3 = por %p1872_p2, %p1871_p1 }
  0x14   :  { %1696 = vmatprep.subr.bf16.mxu1 %v1695_v57  ;;  %v1727_v63 = vpack.c.bf16 %v229_v62, %v228_v61  ;;  %v213_v1 = vld [vmem:[%s2642_s3 + $0x138] sm:$0xff]  ;;  %v1699_v5 = vpack.c.bf16 %v199_v4, %v198_v3  ;;  %v182_v6 = vld [vmem:[%s2642_s3 + $0x40] sm:$0xff]  ;;  %v183_v7 = vld [vmem:[%s2642_s3 + $0x48] sm:$0xff]  ;;  %v315_v4 = vlaneseq }
  0x15   :  { %1722 = vmatpush3.bf16.msra.mxu0 %v1721_v42  ;;  %v1729_v2 = vpack.c.bf16 %v213_v1, %v212_v0  ;;  %v1701_v9 = vpack.c.bf16 %v183_v7, %v182_v6  ;;  %v230_v10 = vld [vmem:[%s2642_s3 + $0x1c0] sm:$0xff]  ;;  %v231_v11 = vld [vmem:[%s2642_s3 + $0x1c8] sm:$0xff]  ;;  %v200_v17 = vld [vmem:[%s2642_s3 + $0xd0] sm:$0xff]  ;;  %p1874_p4 = pnand %p1873_p3, %p1867_p0 }
  0x16   :  { %1724 = vmatprep.subr.bf16.mxu0 %v1723_v51  ;;  %v1731_v12 = vpack.c.bf16 %v231_v11, %v230_v10  ;;  %v214_v14 = vld [vmem:[%s2642_s3 + $0x140] sm:$0xff]  ;;  %v215_v15 = vld [vmem:[%s2642_s3 + $0x148] sm:$0xff]  ;;  %v201_v18 = vld [vmem:[%s2642_s3 + $0xd8] sm:$0xff] }
  0x17   :  { %1698 = vmatpush3.bf16.msra.mxu1 %v1697_v60  ;;  %v1733_v16 = vpack.c.bf16 %v215_v15, %v214_v14  ;;  %v1703_v19 = vpack.c.bf16 %v201_v18, %v200_v17  ;;  %v184_v20 = vld [vmem:[%s2642_s3 + $0x50] sm:$0xff]  ;;  %v185_v21 = vld [vmem:[%s2642_s3 + $0x58] sm:$0xff]  ;;  %v202_v28 = vld [vmem:[%s2642_s3 + $0xe0] sm:$0xff]  ;;  %v2211_v15 = vshrl.u32 %v315_v4, 7 }
  0x18   :  { %1700 = vmatprep.subr.bf16.mxu1 %v1699_v5  ;;  %v1705_v22 = vpack.c.bf16 %v185_v21, %v184_v20  ;;  %v232_v23 = vld [vmem:[%s2642_s3 + $0x1d0] sm:$0xff]  ;;  %v233_v24 = vld [vmem:[%s2642_s3 + $0x1d8] sm:$0xff]  ;;  %v203_v30 = vld [vmem:[%s2642_s3 + $0xe8] sm:$0xff] }
  0x19   :  { %1726 = vmatpush3.bf16.msra.mxu0 %v1725_v54  ;;  %v1735_v25 = vpack.c.bf16 %v233_v24, %v232_v23  ;;  %v216_v26 = vld [vmem:[%s2642_s3 + $0x150] sm:$0xff]  ;;  %v217_v27 = vld [vmem:[%s2642_s3 + $0x158] sm:$0xff]  ;;  %v186_v31 = vld [vmem:[%s2642_s3 + $0x60] sm:$0xff]  ;;  %v1707_v33 = vpack.c.bf16 %v203_v30, %v202_v28 }
  0x1a   :  { %1728 = vmatprep.subr.bf16.mxu0 %v1727_v63  ;;  %v1737_v29 = vpack.c.bf16 %v217_v27, %v216_v26  ;;  %v187_v32 = vld [vmem:[%s2642_s3 + $0x68] sm:$0xff]  ;;  %v234_v35 = vld [vmem:[%s2642_s3 + $0x1e0] sm:$0xff]  ;;  %v204_v40 = vld [vmem:[%s2642_s3 + $0xf0] sm:$0xff] }
  0x1b   :  { %1702 = vmatpush3.bf16.msra.mxu1 %v1701_v9  ;;  %v1709_v34 = vpack.c.bf16 %v187_v32, %v186_v31  ;;  %v235_v36 = vld [vmem:[%s2642_s3 + $0x1e8] sm:$0xff]  ;;  %v218_v37 = vld [vmem:[%s2642_s3 + $0x160] sm:$0xff]  ;;  %v205_v41 = vld [vmem:[%s2642_s3 + $0xf8] sm:$0xff] }
  0x1c   :  { %1704 = vmatprep.subr.bf16.mxu1 %v1703_v19  ;;  %v1739_v38 = vpack.c.bf16 %v235_v36, %v234_v35  ;;  %v219_v39 = vld [vmem:[%s2642_s3 + $0x168] sm:$0xff]  ;;  %v1711_v43 = vpack.c.bf16 %v205_v41, %v204_v40  ;;  %v188_v44 = vld [vmem:[%s2642_s3 + $0x70] sm:$0xff]  ;;  %v189_v45 = vld [vmem:[%s2642_s3 + $0x78] sm:$0xff]  ;;  %v1892_v19 = vmov 1983009808  }
  0x1d   :  { %1730 = vmatpush3.bf16.msra.mxu0 %v1729_v2  ;;  %v1741_v42 = vpack.c.bf16 %v219_v39, %v218_v37  ;;  %v236_v46 = vld [vmem:[%s2642_s3 + $0x1f0] sm:$0xff]  ;;  %v1713_v47 = vpack.c.bf16 %v189_v45, %v188_v44  ;;  %v237_v48 = vld [vmem:[%s2642_s3 + $0x1f8] sm:$0xff]  ;;  %v254_v53 = vld [vmem:[%s2642_s3 + $0x280] sm:$0xff]  ;;  %v313_v20 = vunpack.c.l.s4 %v1892_v19 }
  0x1e   :  { %1732 = vmatprep.subr.bf16.mxu0 %v1731_v12  ;;  %v220_v49 = vld [vmem:[%s2642_s3 + $0x170] sm:$0xff]  ;;  %v221_v50 = vld [vmem:[%s2642_s3 + $0x178] sm:$0xff]  ;;  %v1743_v51 = vpack.c.bf16 %v237_v48, %v236_v46  ;;  %v255_v54 = vld [vmem:[%s2642_s3 + $0x288] sm:$0xff] }
  0x1f   :  { %1706 = vmatpush3.bf16.msra.mxu1 %v1705_v22  ;;  %v1745_v52 = vpack.c.bf16 %v221_v50, %v220_v49  ;;  %v1747_v55 = vpack.c.bf16 %v255_v54, %v254_v53  ;;  %v286_v56 = vld [vmem:[%s2642_s3 + $0x380] sm:$0xff]  ;;  %v287_v57 = vld [vmem:[%s2642_s3 + $0x388] sm:$0xff]  ;;  %v314_v37 = vunpack.c.0.s8 %v313_v20  ;;  %v240_v4 = vld [vmem:[%s2642_s3 + $0x210] sm:$0xff] }
  0x20   :  { %1708 = vmatprep.subr.bf16.mxu1 %v1707_v33  ;;  %v1779_v58 = vpack.c.bf16 %v287_v57, %v286_v56  ;;  %v239_v53 = vld [vmem:[%s2642_s3 + $0x208] sm:$0xff]  ;;  %v258_v19 = vld [vmem:[%s2642_s3 + $0x2a0] sm:$0xff] }
  0x21   :  { %1734 = vmatpush3.bf16.msra.mxu0 %v1733_v16 }
  0x22   :  { %1736 = vmatprep.subr.bf16.mxu0 %v1735_v25 }
  0x23   :  { %1710 = vmatpush3.bf16.msra.mxu1 %v1709_v34 }
  0x24   :  { %1712 = vmatprep.subr.bf16.mxu1 %v1711_v43 }
  0x25   :  { %1738 = vmatpush3.bf16.msra.mxu0 %v1737_v29 }
  0x26   :  { %1740 = vmatprep.subr.bf16.mxu0 %v1739_v38 }
  0x27   :  { %1714 = vmatpush3.bf16.msra.mxu1 %v1713_v47  ;;  %v317_v47 = vsub.s32 %v314_v37, %v2211_v15  ;;  %v292_v37 = vld [vmem:[%s2642_s3 + $0x3b0] sm:$0xff] }
  0x28   :  { %1748 = vmatprep.subr.bf16.mxu1 %v1747_v55 }
  0x29   :  { %1742 = vmatpush3.bf16.msra.mxu0 %v1741_v42 }
  0x2a   :  { %1744 = vmatprep.subr.bf16.mxu0 %v1743_v51 }
  0x2d   :  { %1746 = vmatpush3.bf16.msra.mxu0 %v1745_v52  ;;  %v238_v52 = vld [vmem:[%s2642_s3 + $0x200] sm:$0xff] }
  0x2e   :  { %1780 = vmatprep.subr.bf16.mxu0 %v1779_v58 }
  0x86   :  { %v52_v59 = vpop.permute.xlu0 %51 }
  0xe3   :  { %v131_v60 = vpop.f32.mrb[0].mxu0 }
  0xe4   :  { %v132_v61 = vadd.f32 %v131_v60, %v52_v59  ;;  %v133_v62 = vpop.f32.mrb[1].mxu0  ;;  %v271_v60 = vld [vmem:[%s2642_s3 + $0x308] sm:$0xff] }
  0xe5   :  { %v134_v63 = vadd.f32 %v133_v62, %v52_v59  ;;  %v270_v59 = vld [vmem:[%s2642_s3 + $0x300] sm:$0xff] }
  0xe6   :  { %v2199_v0 = vmax.f32 %v132_v61, 0.0  ;;  %v256_v61 = vld [vmem:[%s2642_s3 + $0x290] sm:$0xff] }
  0xe7   :  { %v2201_v1 = vmax.f32 %v134_v63, 0.0  ;;  %v1749_v63 = vpack.c.bf16 %v239_v53, %v238_v52 }
  0xe8   :  { %138 = vst [vmem:[#allocation2] sm:$0xff] %v2199_v0  ;;  %v726_v2 = vmul.f32 %v2199_v0, %v2199_v0 }
  0xe9   :  { %139 = vst [vmem:[#allocation2 + $0x8] sm:$0xff] %v2201_v1  ;;  %v1072_v3 = vmul.f32 %v2201_v1, %v2201_v1 }
  0xea   :  { %v727_v5 = vsel %vm649_vm2, %v726_v2, 0.0  ;;  %v743_v6 = vsel %vm742_vm3, %v726_v2, 0.0 }
  0xeb   :  { %v1088_v7 = vsel %vm742_vm3, %v1072_v3, 0.0  ;;  %v1073_v9 = vsel %vm649_vm2, %v1072_v3, 0.0  ;;  %v728_v12 = vrot.slane %v727_v5, 4  ;;  %v744_v14 = vrot.slane %v743_v6, 4  ;;  %v257_v3 = vld [vmem:[%s2642_s3 + $0x298] sm:$0xff] }
  0xec   :  { %v1089_v10 = vrot.slane %v1088_v7, 4  ;;  %v1074_v11 = vrot.slane %v1073_v9, 4 }
  0xed   :  { %v729_v26 = vadd.f32 %v728_v12, %v727_v5  ;;  %v745_v27 = vadd.f32 %v744_v14, %v743_v6  ;;  %v288_v12 = vld [vmem:[%s2642_s3 + $0x390] sm:$0xff]  ;;  %v289_v14 = vld [vmem:[%s2642_s3 + $0x398] sm:$0xff] }
  0xee   :  { %v1090_v24 = vadd.f32 %v1089_v10, %v1088_v7  ;;  %v1075_v25 = vadd.f32 %v1074_v11, %v1073_v9  ;;  %v241_v11 = vld [vmem:[%s2642_s3 + $0x218] sm:$0xff] }
  0xef   :  { %v140_v16 = vld [vmem:[#allocation2] ss:$0 sm:$0xff]  ;;  %v142_v17 = vld [vmem:[#allocation2 + $0x1] ss:$0 sm:$0xff]  ;;  %v144_v18 = vld [vmem:[#allocation2 + $0x2] ss:$0 sm:$0xff] }
  0xf0   :  { %141 = vst [vmem:[#allocation3] sm:$0x1] %v140_v16  ;;  %143 = vst [vmem:[#allocation3 + $0x2] sm:$0x1] %v142_v17  ;;  %v146_v21 = vld [vmem:[#allocation2 + $0x3] ss:$0 sm:$0xff]  ;;  %v1781_v16 = vpack.c.bf16 %v271_v60, %v270_v59 }
  0xf1   :  { %145 = vst [vmem:[#allocation3 + $0x4] sm:$0x1] %v144_v18  ;;  %v148_v22 = vld [vmem:[#allocation2 + $0x4] ss:$0 sm:$0xff]  ;;  %v150_v23 = vld [vmem:[#allocation2 + $0x5] ss:$0 sm:$0xff] }
  0xf2   :  { %147 = vst [vmem:[#allocation3 + $0x6] sm:$0x1] %v146_v21  ;;  %149 = vst [vmem:[#allocation3 + $0x8] sm:$0x1] %v148_v22  ;;  %v152_v28 = vld [vmem:[#allocation2 + $0x6] ss:$0 sm:$0xff]  ;;  %v1751_v21 = vpack.c.bf16 %v257_v3, %v256_v61 }
  0xf3   :  { %151 = vst [vmem:[#allocation3 + $0xa] sm:$0x1] %v150_v23  ;;  %v154_v29 = vld [vmem:[#allocation2 + $0x7] ss:$0 sm:$0xff]  ;;  %v156_v30 = vld [vmem:[#allocation2 + $0x8] ss:$0 sm:$0xff] }
  0xf4   :  { %153 = vst [vmem:[#allocation3 + $0xc] sm:$0x1] %v152_v28  ;;  %155 = vst [vmem:[#allocation3 + $0xe] sm:$0x1] %v154_v29  ;;  %v158_v31 = vld [vmem:[#allocation2 + $0x9] ss:$0 sm:$0xff] }
  0xf5   :  { %157 = vst [vmem:[#allocation3 + $0x1] sm:$0x1] %v156_v30  ;;  %v160_v32 = vld [vmem:[#allocation2 + $0xa] ss:$0 sm:$0xff]  ;;  %v162_v33 = vld [vmem:[#allocation2 + $0xb] ss:$0 sm:$0xff] }
  0xf6   :  { %159 = vst [vmem:[#allocation3 + $0x3] sm:$0x1] %v158_v31  ;;  %161 = vst [vmem:[#allocation3 + $0x5] sm:$0x1] %v160_v32  ;;  %v164_v34 = vld [vmem:[#allocation2 + $0xc] ss:$0 sm:$0xff] }
  0xf7   :  { %163 = vst [vmem:[#allocation3 + $0x7] sm:$0x1] %v162_v33  ;;  %v166_v35 = vld [vmem:[#allocation2 + $0xd] ss:$0 sm:$0xff]  ;;  %v168_v36 = vld [vmem:[#allocation2 + $0xe] ss:$0 sm:$0xff] }
  0xf8   :  { %165 = vst [vmem:[#allocation3 + $0x9] sm:$0x1] %v164_v34  ;;  %167 = vst [vmem:[#allocation3 + $0xb] sm:$0x1] %v166_v35  ;;  %v170_v38 = vld [vmem:[#allocation2 + $0xf] ss:$0 sm:$0xff]  ;;  %v1753_v34 = vpack.c.bf16 %v241_v11, %v240_v4 }
  0xf9   :  { %169 = vst [vmem:[#allocation3 + $0xd] sm:$0x1] %v168_v36  ;;  %v1091_v39 = vrot.slane %v1090_v24, 2  ;;  %v1076_v40 = vrot.slane %v1075_v25, 2  ;;  %v730_v41 = vrot.slane %v729_v26, 2  ;;  %v746_v42 = vrot.slane %v745_v27, 2 }
  0xfa   :  { %171 = vst [vmem:[#allocation3 + $0xf] sm:$0x1] %v170_v38  ;;  %v272_v17 = vld [vmem:[%s2642_s3 + $0x310] sm:$0xff]  ;;  %v273_v18 = vld [vmem:[%s2642_s3 + $0x318] sm:$0xff]  ;;  %v259_v23 = vld [vmem:[%s2642_s3 + $0x2a8] sm:$0xff] }
  0xfb   :  { %v1092_v43 = vadd.f32 %v1091_v39, %v1090_v24  ;;  %v1077_v44 = vadd.f32 %v1076_v40, %v1075_v25  ;;  %v731_v45 = vadd.f32 %v730_v41, %v729_v26  ;;  %v747_v46 = vadd.f32 %v746_v42, %v745_v27  ;;  %v290_v24 = vld [vmem:[%s2642_s3 + $0x3a0] sm:$0xff]  ;;  %v291_v25 = vld [vmem:[%s2642_s3 + $0x3a8] sm:$0xff]  ;;  %v260_v32 = vld [vmem:[%s2642_s3 + $0x2b0] sm:$0xff] }
  0xfc   :  { %v1783_v27 = vpack.c.bf16 %v289_v14, %v288_v12  ;;  %v242_v28 = vld [vmem:[%s2642_s3 + $0x220] sm:$0xff]  ;;  %v243_v29 = vld [vmem:[%s2642_s3 + $0x228] sm:$0xff]  ;;  %v261_v33 = vld [vmem:[%s2642_s3 + $0x2b8] sm:$0xff]  ;;  %v1755_v39 = vpack.c.bf16 %v259_v23, %v258_v19 }
  0xfd   :  { %v1093_v48 = vrot.slane %v1092_v43, 1  ;;  %v1078_v49 = vrot.slane %v1077_v44, 1  ;;  %v732_v50 = vrot.slane %v731_v45, 1  ;;  %v748_v51 = vrot.slane %v747_v46, 1  ;;  %v2288_v30 = vld [vmem:[%s2642_s3 + $0x320] sm:$0xff]  ;;  %v275_v31 = vld [vmem:[%s2642_s3 + $0x328] sm:$0xff] }
  0xfe   :  { %v172_v54 = vld [vmem:[#allocation3] sm:$0xff]  ;;  %v2308_v36 = vld [vmem:[%s2642_s3 + $0x238] sm:$0xff]  ;;  %v1789_v52 = vpack.c.bf16 %v275_v31, %v2288_v30  ;;  %v1759_v53 = vpack.c.bf16 %v261_v33, %v260_v32  ;;  %v278_v23 = vld [vmem:[%s2642_s3 + $0x340] sm:$0xff] }
  0xff   :  { %v2220_v55 = vadd.f32 %v1093_v48, %v1092_v43  ;;  %v2222_v56 = vadd.f32 %v1078_v49, %v1077_v44  ;;  %v311_v57 = vcombine.high %v172_v54, %v172_v54  ;;  %v318_v58 = vrot.slane %v172_v54, %v317_v47  ;;  %v2303_v35 = vld [vmem:[%s2642_s3 + $0x230] sm:$0xff]  ;;  %v293_v40 = vld [vmem:[%s2642_s3 + $0x3b8] sm:$0xff]  ;;  %v2331_v44 = vld [vmem:[%s2642_s3 + $0x2c0] sm:$0xff] }
 0x100   :  { %v2233_v62 = vadd.f32 %v732_v50, %v731_v45  ;;  %v2242_v5 = vadd.f32 %v748_v51, %v747_v46  ;;  %v2321_v41 = vld [vmem:[%s2642_s3 + $0x330] sm:$0xff]  ;;  %v2326_v42 = vld [vmem:[%s2642_s3 + $0x338] sm:$0xff]  ;;  %v1785_v43 = vpack.c.bf16 %v273_v18, %v272_v17  ;;  %v2336_v45 = vld [vmem:[%s2642_s3 + $0x2c8] sm:$0xff]  ;;  %v1757_v51 = vpack.c.bf16 %v243_v29, %v242_v28 }
 0x101   :  { %v173_v2 = vld [vmem:[#allocation3 + $0x8] sm:$0xff]  ;;  %1834 = vrsqrt.f32 %v2220_v55  ;;  %v326_v6 = vcombine.high %v318_v58, %v318_v58  ;;  %v325_v7 = vrot.slane %v311_v57, %v317_v47  ;;  %v2341_v46 = vld [vmem:[%s2642_s3 + $0x240] sm:$0xff]  ;;  %v2346_v48 = vld [vmem:[%s2642_s3 + $0x248] sm:$0xff]  ;;  %v1761_v57 = vpack.c.bf16 %v2308_v36, %v2303_v35 }
 0x102   :  { %v2244_v9 = vrot.slane %v173_v2, %v317_v47  ;;  %v328_v10 = vcombine.high %v173_v2, %v173_v2  ;;  %1836 = vrsqrt.f32 %v2222_v56  ;;  %v2351_v49 = vld [vmem:[%s2642_s3 + $0x3c0] sm:$0xff]  ;;  %v2356_v50 = vld [vmem:[%s2642_s3 + $0x3c8] sm:$0xff]  ;;  %v1793_v59 = vpack.c.bf16 %v2326_v42, %v2321_v41  ;;  %v265_v18 = vld [vmem:[%s2642_s3 + $0x2d8] sm:$0xff] }
 0x103   :  { %417 = vmatprep.mubr.f32.mxu1 %v326_v6  ;;  %v327_v20 = vcombine.high %v325_v7, %v325_v7  ;;  %1838 = vrsqrt.f32 %v2233_v62  ;;  %v1763_v60 = vpack.c.bf16 %v2336_v45, %v2331_v44  ;;  %v1765_v61 = vpack.c.bf16 %v2346_v48, %v2341_v46  ;;  %v296_v28 = vld [vmem:[%s2642_s3 + $0x3d0] sm:$0xff]  ;;  %v297_v29 = vld [vmem:[%s2642_s3 + $0x3d8] sm:$0xff]  ;;  %v299_v44 = vld [vmem:[%s2642_s3 + $0x3e8] sm:$0xff] }
 0x104   :  { %v2265_v22 = vrot.slane %v328_v10, %v317_v47  ;;  %418 = vmatmul.mubr.f32.vlgmr.msra.gmra.mrb[0].mxu1 %v318_v58  ;;  %v343_v26 = vcombine.high %v2244_v9, %v2244_v9  ;;  %1840 = vrsqrt.f32 %v2242_v5  ;;  %v1787_v47 = vpack.c.bf16 %v291_v25, %v290_v24  ;;  %v279_v24 = vld [vmem:[%s2642_s3 + $0x348] sm:$0xff]  ;;  %v248_v33 = vld [vmem:[%s2642_s3 + $0x250] sm:$0xff]  ;;  %v281_v41 = vld [vmem:[%s2642_s3 + $0x358] sm:$0xff] }
 0x105   :  { %1750 = vmatpush3.bf16.msra.mxu1 %v1749_v63  ;;  %487 = vmatprep.mubr.f32.mxu0 %v327_v20  ;;  %v1791_v58 = vpack.c.bf16 %v293_v40, %v292_v37  ;;  %v1795_v63 = vpack.c.bf16 %v2356_v50, %v2351_v49  ;;  %vm1097_vm4 = vcmp.eq.f32.partialorder %v2220_v55, inf  ;;  %vm1099_vm5 = vcmp.eq.f32.partialorder %v2220_v55, 0.0  ;;  %v280_v40 = vld [vmem:[%s2642_s3 + $0x350] sm:$0xff]  ;;  %v250_v46 = vld [vmem:[%s2642_s3 + $0x260] sm:$0xff]  ;;  %v269_v50 = vld [vmem:[%s2642_s3 + $0x2f8] sm:$0xff] }
 0x106   :  { %557 = vmatprep.mubr.f32.mxu1 %v343_v26  ;;  %488 = vmatmul.mubr.f32.vlgmr.msra.gmra.mrb[2].mxu0 %v325_v7  ;;  %v344_v38 = vcombine.high %v2265_v22, %v2265_v22  ;;  %v1100_v4 = vand.u32 2147483648, %v2220_v55  ;;  %vm1082_vm6 = vcmp.eq.f32.partialorder %v2222_v56, inf  ;;  %vm1084_vm7 = vcmp.eq.f32.partialorder %v2222_v56, 0.0  ;;  %v268_v49 = vld [vmem:[%s2642_s3 + $0x2f0] sm:$0xff] }
 0x107   :  { %1782 = vmatpush3.bf16.msra.mxu0 %v1781_v16  ;;  %1752 = vmatprep.subr.bf16.mxu1 %v1751_v21  ;;  %v1085_v11 = vand.u32 2147483648, %v2222_v56  ;;  %vm736_vm8 = vcmp.eq.f32.partialorder %v2233_v62, inf  ;;  %vm738_vm9 = vcmp.eq.f32.partialorder %v2233_v62, 0.0  ;;  %v739_v17 = vand.u32 2147483648, %v2233_v62 }
 0x108   :  { %627 = vmatprep.mubr.f32.mxu0 %v344_v38  ;;  %1784 = vmatprep.subr.bf16.mxu0 %v1783_v27  ;;  %vm752_vm10 = vcmp.eq.f32.partialorder %v2242_v5, inf  ;;  %vm754_vm11 = vcmp.eq.f32.partialorder %v2242_v5, 0.0  ;;  %v755_v27 = vand.u32 2147483648, %v2242_v5  ;;  %v1797_v37 = vpack.c.bf16 %v279_v24, %v278_v23  ;;  %v636_v23 = vld [vmem:[%s2644_s5 + $0x10] sm:$0xff]  ;;  %v637_v24 = vld [vmem:[%s2644_s5 + $0x18] sm:$0xff] }
 0x109   :  { %1754 = vmatpush3.bf16.msra.mxu1 %v1753_v34  ;;  %v249_v34 = vld [vmem:[%s2642_s3 + $0x258] sm:$0xff]  ;;  %v1801_v48 = vpack.c.bf16 %v281_v41, %v280_v40 }
 0x10a   :  { %1756 = vmatprep.subr.bf16.mxu1 %v1755_v39  ;;  %v1799_v39 = vpack.c.bf16 %v297_v29, %v296_v28  ;;  %v1769_v42 = vpack.c.bf16 %v249_v34, %v248_v33  ;;  %v1317_v29 = vld [vmem:[%s2646_s7] sm:$0xff]  ;;  %v1322_v34 = vld [vmem:[%s2646_s7 + $0x28] sm:$0xff] }
 0x10b   :  { %v1835_v54 = vpop.eup %1834  ;;  %1786 = vmatpush3.bf16.msra.mxu0 %v1785_v43  ;;  %v298_v43 = vld [vmem:[%s2642_s3 + $0x3e0] sm:$0xff] }
 0x10c   :  { %v1096_v2 = vmul.f32 %v1835_v54, %v2220_v55  ;;  %v1837_v3 = vpop.eup %1836  ;;  %1788 = vmatprep.subr.bf16.mxu0 %v1787_v47  ;;  %v251_v47 = vld [vmem:[%s2642_s3 + $0x268] sm:$0xff] }
 0x10d   :  { %v1839_v6 = vpop.eup %1838  ;;  %1758 = vmatpush3.bf16.msra.mxu1 %v1757_v51  ;;  %v1081_v10 = vmul.f32 %v1837_v3, %v2222_v56  ;;  %v1803_v51 = vpack.c.bf16 %v299_v44, %v298_v43  ;;  %v1773_v54 = vpack.c.bf16 %v251_v47, %v250_v46 }
 0x10e   :  { %v1098_v7 = vsel %vm1097_vm4, %v2220_v55, %v1096_v2  ;;  %v1841_v12 = vpop.eup %1840  ;;  %1760 = vmatprep.subr.bf16.mxu1 %v1759_v53  ;;  %v735_v16 = vmul.f32 %v1839_v6, %v2233_v62  ;;  %v264_v55 = vld [vmem:[%s2642_s3 + $0x2d0] sm:$0xff]  ;;  %v283_v53 = vld [vmem:[%s2642_s3 + $0x368] sm:$0xff]  ;;  %v285_v6 = vld [vmem:[%s2642_s3 + $0x378] sm:$0xff] }
 0x10f   :  { %v1101_v14 = vsel %vm1099_vm5, %v1100_v4, %v1098_v7  ;;  %1790 = vmatpush3.bf16.msra.mxu0 %v1789_v52  ;;  %v1083_v20 = vsel %vm1082_vm6, %v2222_v56, %v1081_v10  ;;  %v751_v21 = vmul.f32 %v1841_v12, %v2242_v5  ;;  %v1767_v32 = vpack.c.bf16 %v265_v18, %v264_v55  ;;  %v282_v52 = vld [vmem:[%s2642_s3 + $0x360] sm:$0xff]  ;;  %v284_v4 = vld [vmem:[%s2642_s3 + $0x370] sm:$0xff] }
 0x110   :  { %v1102_v19 = vadd.f32 1e-06, %v1101_v14  ;;  %1792 = vmatprep.subr.bf16.mxu0 %v1791_v58  ;;  %v1086_v25 = vsel %vm1084_vm7, %v1085_v11, %v1083_v20  ;;  %v737_v26 = vsel %vm736_vm8, %v2233_v62, %v735_v16  ;;  %v266_v62 = vld [vmem:[%s2642_s3 + $0x2e0] sm:$0xff]  ;;  %v301_v58 = vld [vmem:[%s2642_s3 + $0x3f8] sm:$0xff]  ;;  %v1805_v2 = vpack.c.bf16 %v283_v53, %v282_v52 }
 0x111   :  { %1762 = vmatpush3.bf16.msra.mxu1 %v1761_v57  ;;  %v1087_v56 = vadd.f32 1e-06, %v1086_v25  ;;  %v740_v30 = vsel %vm738_vm9, %v739_v17, %v737_v26  ;;  %v753_v31 = vsel %vm752_vm10, %v2242_v5, %v751_v21  ;;  %v267_v5 = vld [vmem:[%s2642_s3 + $0x2e8] sm:$0xff]  ;;  %v300_v57 = vld [vmem:[%s2642_s3 + $0x3f0] sm:$0xff]  ;;  %v634_v16 = vld [vmem:[%s2644_s5] sm:$0xff]  ;;  %v1809_v18 = vpack.c.bf16 %v285_v6, %v284_v4 }
 0x112   :  { %1842 = vrcp.f32 %v1102_v19  ;;  %1764 = vmatprep.subr.bf16.mxu1 %v1763_v60  ;;  %v741_v35 = vadd.f32 1e-06, %v740_v30  ;;  %v756_v36 = vsel %vm754_vm11, %v755_v27, %v753_v31  ;;  %v1771_v45 = vpack.c.bf16 %v267_v5, %v266_v62  ;;  %v252_v60 = vld [vmem:[%s2642_s3 + $0x270] sm:$0xff]  ;;  %v635_v17 = vld [vmem:[%s2644_s5 + $0x8] sm:$0xff]  ;;  %v1440_v52 = vld [vmem:[%s2643_s4] ss:$0 sm:$0xff] }
 0x113   :  { %1794 = vmatpush3.bf16.msra.mxu0 %v1793_v59  ;;  %1844 = vrcp.f32 %v1087_v56  ;;  %v757_v38 = vadd.f32 1e-06, %v756_v36  ;;  %v1775_v59 = vpack.c.bf16 %v269_v50, %v268_v49  ;;  %v1807_v3 = vpack.c.bf16 %v301_v58, %v300_v57  ;;  %v639_v26 = vld [vmem:[%s2644_s5 + $0x28] sm:$0xff]  ;;  %v977_v56 = vld [vmem:[%s2646_s7 + $0x20] sm:$0xff]  ;;  %v1319_v31 = vld [vmem:[%s2646_s7 + $0x10] sm:$0xff] }
 0x114   :  { %1796 = vmatprep.subr.bf16.mxu0 %v1795_v63  ;;  %1846 = vrcp.f32 %v741_v35  ;;  %v1812_v21 = vpack.c.bf16 %v635_v17, %v634_v16  ;;  %v1815_v25 = vpack.c.bf16 %v637_v24, %v636_v23  ;;  %v1318_v30 = vld [vmem:[%s2646_s7 + $0x8] sm:$0xff]  ;;  %v1324_v35 = vld [vmem:[%s2646_s7 + $0x38] sm:$0xff]  ;;  %v1396_v36 = vld [vmem:[#allocation4] sm:$0x1] }
 0x115   :  { %1766 = vmatpush3.bf16.msra.mxu1 %v1765_v61  ;;  %1848 = vrcp.f32 %v757_v38  ;;  %v253_v61 = vld [vmem:[%s2642_s3 + $0x278] sm:$0xff] }
 0x116   :  { %1768 = vmatprep.subr.bf16.mxu1 %v1767_v32  ;;  %v1777_v11 = vpack.c.bf16 %v253_v61, %v252_v60  ;;  %v1320_v32 = vld [vmem:[%s2646_s7 + $0x18] sm:$0xff] }
 0x117   :  { %1798 = vmatpush3.bf16.msra.mxu0 %v1797_v37 }
 0x118   :  { %1800 = vmatprep.subr.bf16.mxu0 %v1799_v39 }
 0x119   :  { %1770 = vmatpush3.bf16.msra.mxu1 %v1769_v42 }
 0x11a   :  { %1772 = vmatprep.subr.bf16.mxu1 %v1771_v45 }
 0x11b   :  { %1802 = vmatpush3.bf16.msra.mxu0 %v1801_v48 }
 0x11c   :  { %v1843_v63 = vpop.eup %1842  ;;  %1804 = vmatprep.subr.bf16.mxu0 %v1803_v51 }
 0x11d   :  { %v1106_v7 = vmul.f32 %v1843_v63, %v2201_v1  ;;  %v1845_v10 = vpop.eup %1844  ;;  %1774 = vmatpush3.bf16.msra.mxu1 %v1773_v54 }
 0x11e   :  { %v1847_v12 = vpop.eup %1846  ;;  %1776 = vmatprep.subr.bf16.mxu1 %v1775_v59  ;;  %v1104_v14 = vmul.f32 %v1845_v10, %v2201_v1  ;;  %v1894_v1 = vmov 0.0|0.0  }
 0x11f   :  { %1140 = vrot.lane.b32.xlu0 %v1106_v7, %s1893_s12  ;;  %v1849_v55 = vpop.eup %1848  ;;  %1806 = vmatpush3.bf16.msra.mxu0 %v1805_v2  ;;  %v759_v19 = vmul.f32 %v1847_v12, %v2199_v0 }
 0x120   :  { %1808 = vmatprep.subr.bf16.mxu0 %v1807_v3  ;;  %1107 = vxpose.xlu1.b32.start.end [1/1] (short) (narrow) %v1104_v14, 64  ;;  %v761_v20 = vmul.f32 %v1849_v55, %v2199_v0  ;;  %v638_v0 = vld [vmem:[%s2644_s5 + $0x20] sm:$0xff] }
 0x121   :  { %1778 = vmatpush3.bf16.msra.mxu1 %v1777_v11  ;;  %v1818_v27 = vpack.c.bf16 %v639_v26, %v638_v0 }
 0x122   :  { %1811 = vmatprep.subr.bf16.mxu1 %v1894_v1 }
 0x123   :  { %1810 = vmatpush3.bf16.msra.mxu0 %v1809_v18 }
 0x124   :  { %558 = vmatmul.mubr.f32.vlgmr.msra.gmra.mrb[2].mxu1 %v2244_v9  ;;  %v640_v9 = vld [vmem:[%s2644_s5 + $0x30] sm:$0xff] }
 0x125   :  { %1813 = vmatpush3.bf16.msra.mxu1 %v1812_v21  ;;  %1644 = vmatprep.mubr.msk.f32.mxu1 %vm1895_vm12, %v1890_v8  ;;  %v1052_v8 = vld [vmem:[#allocation4] sm:$0x1] }
 0x126   :  { %628 = vmatmul.mubr.f32.vlgmr.msra.gmra.mrb[4].mxu0 %v2265_v22  ;;  %1814 = vmatprep.subr.bf16.mxu1 %v1894_v1  ;;  %v641_v22 = vld [vmem:[%s2644_s5 + $0x38] sm:$0xff] }
 0x127   :  { %v1821_v28 = vpack.c.bf16 %v641_v22, %v640_v9 }
 0x129   :  { %1816 = vmatpush3.bf16.msra.mxu1 %v1815_v25 }
 0x12a   :  { %1817 = vmatprep.subr.bf16.mxu1 %v1894_v1 }
 0x12d   :  { %1819 = vmatpush3.bf16.msra.mxu1 %v1818_v27 }
 0x12e   :  { %1820 = vmatprep.subr.bf16.mxu1 %v1894_v1 }
 0x131   :  { %1822 = vmatpush3.bf16.msra.mxu1 %v1821_v28 }
 0x13d   :  { %762 = vxpose.xlu0.b32.start.end [1/1] (short) (narrow) %v759_v19, 64 }
 0x13e   :  { %1831 = vset.pattern.permute.xlu1 %v1891_v13  ;;  %v979_v13 = vld [vmem:[%s2646_s7 + $0x30] sm:$0xff] }
 0x15a   :  { %795 = vrot.lane.b32.xlu1 %v761_v20, %s1893_s12 }
 0x15e   :  { %1332 = vperm.xlu1 %1831, %v1318_v30  }
 0x162   :  { %1337 = vperm.xlu1 %1831, %v1319_v31  }
 0x166   :  { %1342 = vperm.xlu1 %1831, %v1320_v32  }
 0x16a   :  { %1347 = vperm.xlu1 %1831, %v977_v56  }
 0x16e   :  { %1352 = vperm.xlu1 %1831, %v1322_v34  }
 0x172   :  { %1357 = vperm.xlu1 %1831, %v979_v13  }
 0x176   :  { %1362 = vperm.xlu1 %1831, %v1324_v35  }
 0x17a   :  { %1399 = vperm.xlu1 %1831, %v1396_v36  }
 0x17e   :  { %983 = vperm.xlu1 %1831, %v1317_v29  }
 0x182   :  { %1327 = vperm.xlu0 %1830, %v1317_v29   ;;  %988 = vperm.xlu1 %1831, %v1318_v30  }
 0x186   :  { %1003 = vperm.xlu0 %1830, %v977_v56   ;;  %993 = vperm.xlu1 %1831, %v1319_v31  }
 0x18a   :  { %1013 = vperm.xlu0 %1830, %v979_v13   ;;  %998 = vperm.xlu1 %1831, %v1320_v32  }
 0x18e   :  { %1055 = vperm.xlu0 %1830, %v1052_v8   ;;  %1008 = vperm.xlu1 %1831, %v1322_v34  }
 0x191   :  { %v1141_v33 = vpop.permute.xlu0 %1140 }
 0x192   :  { %1661 = vmatprep.subr.mxu1 %v1141_v33  ;;  %1018 = vperm.xlu1 %1831, %v1324_v35  }
 0x1a0   :  { %v1123_v37 = vpop.trf.xlu1 }
 0x1a4   :  { %v1124_v62 = vpop.trf.xlu1 }
 0x1a8   :  { %v1125_v5 = vpop.trf.xlu1 }
 0x1ac   :  { %v1126_v38 = vpop.trf.xlu1 }
 0x1b0   :  { %v1127_v39 = vpop.trf.xlu1 }
 0x1b4   :  { %v1128_v40 = vpop.trf.xlu1 }
 0x1b8   :  { %v1129_v43 = vpop.trf.xlu1 }
 0x1bc   :  { %v1130_v45 = vpop.trf.xlu1 }
 0x1bd   :  { %v778_v41 = vpop.trf.xlu0 }
 0x1be   :  { %1649 = vmatprep.mubr.msk.f32.mxu0 %vm798_vm13, %v778_v41 }
 0x1c1   :  { %v779_v42 = vpop.trf.xlu0 }
 0x1c5   :  { %v780_v44 = vpop.trf.xlu0 }
 0x1c9   :  { %v781_v46 = vpop.trf.xlu0 }
 0x1cc   :  { %v796_v47 = vpop.permute.xlu1 %795 }
 0x1cd   :  { %v782_v48 = vpop.trf.xlu0  ;;  %1647 = vmatprep.subr.mxu0 %v796_v47 }
 0x1ce   :  { %1648 = vmatpush3.msra.mxu0 %v796_v47 }
 0x1cf   :  { %1650 = vmatmul.mubr.msk.f32.vlgmr.msra.gmra.mrb[6].mxu0 %vm798_vm13, %v779_v42 }
 0x1d0   :  { %1652 = vmatprep.mubr.msk.f32.mxu0 %vm798_vm13, %v780_v44 }
 0x1d1   :  { %v783_v49 = vpop.trf.xlu0 }
 0x1d3   :  { %1653 = vmatmul.mubr.msk.f32.gmra.mrb[8].mxu0 %vm798_vm13, %v781_v46 }
 0x1d4   :  { %1655 = vmatprep.mubr.msk.f32.mxu0 %vm798_vm13, %v782_v48 }
 0x1d5   :  { %v784_v50 = vpop.trf.xlu0 }
 0x1d7   :  { %v1493_v51 = vpop.f32.mrb[0].mxu1  ;;  %1656 = vmatmul.mubr.msk.f32.gmra.mrb[10].mxu0 %vm798_vm13, %v783_v49 }
 0x1d8   :  { %v1494_v53 = vpop.f32.mrb[1].mxu1  ;;  %1658 = vmatprep.mubr.msk.f32.mxu0 %vm798_vm13, %v784_v50 }
 0x1d9   :  { %v785_v54 = vpop.trf.xlu0  ;;  %v1495_v57 = vadd.f32 %v1494_v53, %v1493_v51  ;;  %v1528_v58 = vpop.f32.mrb[2].mxu0 }
 0x1da   :  { %v1529_v59 = vpop.f32.mrb[3].mxu0 }
 0x1db   :  { %v420_v60 = vadd.f32 %v1495_v57, %v1440_v52  ;;  %v1530_v61 = vadd.f32 %v1529_v59, %v1528_v58  ;;  %1659 = vmatmul.mubr.msk.f32.gmra.mrb[12].mxu0 %vm798_vm13, %v785_v54 }
 0x1dd   :  { %v490_v63 = vadd.f32 %v1530_v61, %v420_v60  ;;  %v2553_v16 = vpop.permute.xlu1 %1332 }
 0x1e1   :  { %v2555_v17 = vpop.permute.xlu1 %1337 }
 0x1e5   :  { %v2557_v55 = vpop.permute.xlu1 %1342 }
 0x1e9   :  { %v2559_v18 = vpop.permute.xlu1 %1347 }
 0x1ed   :  { %v2561_v19 = vpop.permute.xlu1 %1352 }
 0x1f1   :  { %v2563_v20 = vpop.permute.xlu1 %1357 }
 0x1f5   :  { %v2565_v21 = vpop.permute.xlu1 %1362 }
 0x1f7   :  { %v1563_v2 = vpop.f32.mrb[2].mxu1 }
 0x1f8   :  { %v1564_v3 = vpop.f32.mrb[3].mxu1 }
 0x1f9   :  { %v1565_v4 = vadd.f32 %v1564_v3, %v1563_v2  ;;  %v1598_v6 = vpop.f32.mrb[4].mxu0  ;;  %v2567_v1 = vpop.permute.xlu1 %1399 }
 0x1fa   :  { %v1599_v7 = vpop.f32.mrb[5].mxu0 }
 0x1fb   :  { %v560_v10 = vadd.f32 %v1565_v4, %v490_v63  ;;  %v1600_v11 = vadd.f32 %v1599_v7, %v1598_v6 }
 0x1fd   :  { %v630_v12 = vadd.f32 %v1600_v11, %v560_v10  ;;  %v984_v23 = vpop.permute.xlu1 %983 }
 0x1ff   :  { %v633_v14 = vmax.f32 %v630_v12, 0.0 }
 0x201   :  { %1645 = vmatmul.mubr.msk.f32.vlgmr.msra.gmra.mrb[4].mxu1 %vm649_vm2, %v633_v14  ;;  %v989_v24 = vpop.permute.xlu1 %988  ;;  %v2569_v28 = vpop.permute.xlu0 %1327 }
 0x202   :  { %1662 = vmatpush3.msra.mxu1 %v1141_v33  ;;  %1663 = vmatprep.mubr.msk.f32.mxu1 %vm798_vm13, %v1123_v37 }
 0x205   :  { %1664 = vmatmul.mubr.msk.f32.vlgmr.msra.gmra.mrb[6].mxu1 %vm798_vm13, %v1124_v62  ;;  %v994_v25 = vpop.permute.xlu1 %993  ;;  %v1004_v44 = vpop.permute.xlu0 %1003 }
 0x206   :  { %1666 = vmatprep.mubr.msk.f32.mxu1 %vm798_vm13, %v1125_v5 }
 0x209   :  { %1667 = vmatmul.mubr.msk.f32.gmra.mrb[8].mxu1 %vm798_vm13, %v1126_v38  ;;  %v999_v26 = vpop.permute.xlu1 %998  ;;  %v1014_v14 = vpop.permute.xlu0 %1013 }
 0x20a   :  { %1669 = vmatprep.mubr.msk.f32.mxu1 %vm798_vm13, %v1127_v39 }
 0x20d   :  { %1670 = vmatmul.mubr.msk.f32.gmra.mrb[10].mxu1 %vm798_vm13, %v1128_v40  ;;  %v1009_v62 = vpop.permute.xlu1 %1008 }
 0x20e   :  { %1672 = vmatprep.mubr.msk.f32.mxu1 %vm798_vm13, %v1129_v43 }
 0x211   :  { %1673 = vmatmul.mubr.msk.f32.gmra.mrb[12].mxu1 %vm798_vm13, %v1130_v45  ;;  %v1019_v61 = vpop.permute.xlu1 %1018 }
 0x2a2   :  { %v1651_v0 = vpop.f32.mrb[6].mxu0 }
 0x2a3   :  { %v929_v27 = vmax.f32 %v1651_v0, 0.0  ;;  %v889_v9 = vpop.f32.mrb[7].mxu0 }
 0x2a4   :  { %v928_v22 = vmax.f32 %v889_v9, 0.0 }
 0x2a5   :  { %v937_v29 = vmul.f32 %v929_v27, %v929_v27  ;;  %v1022_v56 = vmul.f32 %v989_v24, %v929_v27 }
 0x2a6   :  { %v936_v30 = vmul.f32 %v928_v22, %v928_v22  ;;  %v1021_v13 = vmul.f32 %v984_v23, %v928_v22  ;;  %v1654_v31 = vpop.f32.mrb[8].mxu0 }
 0x2a7   :  { %v945_v8 = vsel %vm649_vm2, %v937_v29, 0.0  ;;  %v1030_v32 = vsel %vm649_vm2, %v1022_v56, 0.0  ;;  %v931_v33 = vmax.f32 %v1654_v31, 0.0  ;;  %v899_v34 = vpop.f32.mrb[9].mxu0 }
 0x2a8   :  { %v944_v35 = vsel %vm649_vm2, %v936_v30, 0.0  ;;  %v1029_v36 = vsel %vm649_vm2, %v1021_v13, 0.0  ;;  %v930_v37 = vmax.f32 %v899_v34, 0.0 }
 0x2a9   :  { %v946_v5 = vadd.f32 %v945_v8, %v944_v35  ;;  %v1031_v38 = vadd.f32 %v1030_v32, %v1029_v36  ;;  %v939_v39 = vmul.f32 %v931_v33, %v931_v33  ;;  %v1024_v40 = vmul.f32 %v999_v26, %v931_v33 }
 0x2aa   :  { %v938_v41 = vmul.f32 %v930_v37, %v930_v37  ;;  %v1023_v42 = vmul.f32 %v994_v25, %v930_v37  ;;  %v1657_v43 = vpop.f32.mrb[10].mxu0 }
 0x2ab   :  { %v949_v45 = vsel %vm649_vm2, %v939_v39, 0.0  ;;  %v933_v46 = vmax.f32 %v1657_v43, 0.0  ;;  %v909_v47 = vpop.f32.mrb[11].mxu0  ;;  %v1034_v50 = vsel %vm649_vm2, %v1024_v40, 0.0 }
 0x2ac   :  { %v947_v48 = vsel %vm649_vm2, %v938_v41, 0.0  ;;  %v1032_v49 = vsel %vm649_vm2, %v1023_v42, 0.0  ;;  %v932_v51 = vmax.f32 %v909_v47, 0.0 }
 0x2ad   :  { %v948_v52 = vadd.f32 %v947_v48, %v946_v5  ;;  %v941_v53 = vmul.f32 %v933_v46, %v933_v46  ;;  %v1033_v54 = vadd.f32 %v1032_v49, %v1031_v38  ;;  %v1026_v57 = vmul.f32 %v1009_v62, %v933_v46 }
 0x2ae   :  { %v940_v58 = vmul.f32 %v932_v51, %v932_v51  ;;  %v1025_v59 = vmul.f32 %v1004_v44, %v932_v51  ;;  %v1660_v60 = vpop.f32.mrb[12].mxu0 }
 0x2af   :  { %v953_v63 = vsel %vm649_vm2, %v941_v53, 0.0  ;;  %v1035_v2 = vadd.f32 %v1034_v50, %v1033_v54  ;;  %v950_v3 = vadd.f32 %v949_v45, %v948_v52  ;;  %v935_v4 = vmax.f32 %v1660_v60, 0.0  ;;  %v919_v6 = vpop.f32.mrb[13].mxu0  ;;  %v1441_v45 = vld [vmem:[%s2645_s6] ss:$0 sm:$0xff] }
 0x2b0   :  { %v951_v7 = vsel %vm649_vm2, %v940_v58, 0.0  ;;  %v1036_v10 = vsel %vm649_vm2, %v1025_v59, 0.0  ;;  %v1038_v11 = vsel %vm649_vm2, %v1026_v57, 0.0  ;;  %v934_v12 = vmax.f32 %v919_v6, 0.0 }
 0x2b1   :  { %v952_v23 = vadd.f32 %v951_v7, %v950_v3  ;;  %v943_v24 = vmul.f32 %v935_v4, %v935_v4  ;;  %v1037_v25 = vadd.f32 %v1036_v10, %v1035_v2  ;;  %v1028_v0 = vmul.f32 %v1019_v61, %v935_v4 }
 0x2b2   :  { %v942_v26 = vmul.f32 %v934_v12, %v934_v12  ;;  %v1027_v27 = vmul.f32 %v1014_v14, %v934_v12  ;;  %v1060_v3 = vsub.s32 0, %v2211_v15 }
 0x2b3   :  { %v1039_v9 = vadd.f32 %v1038_v11, %v1037_v25  ;;  %v954_v22 = vadd.f32 %v953_v63, %v952_v23  ;;  %v957_v29 = vsel %vm649_vm2, %v943_v24, 0.0  ;;  %v1042_v13 = vsel %vm649_vm2, %v1028_v0, 0.0  ;;  %v1056_v11 = vpop.permute.xlu0 %1055 }
 0x2b4   :  { %v955_v56 = vsel %vm649_vm2, %v942_v26, 0.0  ;;  %v1040_v30 = vsel %vm649_vm2, %v1027_v27, 0.0 }
 0x2b5   :  { %v956_v31 = vadd.f32 %v955_v56, %v954_v22  ;;  %v1041_v8 = vadd.f32 %v1040_v30, %v1039_v9 }
 0x2b7   :  { %v958_v32 = vadd.f32 %v957_v29, %v956_v31  ;;  %v1043_v33 = vadd.f32 %v1042_v13, %v1041_v8  ;;  %v1061_v29 = vrot.slane %v1056_v11, %v1060_v3 }
 0x2b9   :  { %v959_v34 = vrot.slane %v958_v32, 4  ;;  %v1044_v38 = vrot.slane %v1043_v33, 4 }
 0x2bb   :  { %v960_v35 = vadd.f32 %v959_v34, %v958_v32  ;;  %v1045_v39 = vadd.f32 %v1044_v38, %v1043_v33 }
 0x2bd   :  { %v961_v36 = vrot.slane %v960_v35, 2  ;;  %v1046_v44 = vrot.slane %v1045_v39, 2 }
 0x2bf   :  { %v962_v37 = vadd.f32 %v961_v36, %v960_v35  ;;  %v1047_v51 = vadd.f32 %v1046_v44, %v1045_v39 }
 0x2c1   :  { %v963_v62 = vrot.slane %v962_v37, 1  ;;  %v1048_v57 = vrot.slane %v1047_v51, 1 }
 0x2c3   :  { %v964_v5 = vadd.f32 %v963_v62, %v962_v37  ;;  %v1049_v12 = vadd.f32 %v1048_v57, %v1047_v51 }
 0x2c5   :  { %1850 = vrsqrt.f32 %v964_v5  ;;  %vm967_vm14 = vcmp.eq.f32.partialorder %v964_v5, inf  ;;  %v970_v41 = vand.u32 2147483648, %v964_v5  ;;  %vm969_vm15 = vcmp.eq.f32.partialorder %v964_v5, 0.0 }
 0x2cf   :  { %v1851_v40 = vpop.eup %1850 }
 0x2d0   :  { %v966_v42 = vmul.f32 %v1851_v40, %v964_v5 }
 0x2d2   :  { %v968_v43 = vsel %vm967_vm14, %v964_v5, %v966_v42 }
 0x2d3   :  { %v971_v46 = vsel %vm969_vm15, %v970_v41, %v968_v43 }
 0x2d4   :  { %v972_v47 = vadd.f32 1e-06, %v971_v46  ;;  %v719_v48 = vpop.f32.mrb[4].mxu1 }
 0x2d5   :  { %v720_v49 = vadd.f32 %v1441_v45, %v719_v48  ;;  %v1646_v50 = vpop.f32.mrb[5].mxu1 }
 0x2d6   :  { %1852 = vrcp.f32 %v972_v47 }
 0x2d7   :  { %724 = vst.msk [vmem:[#allocation5] sm:$0x3] %vm723_vm0, %v720_v49 }
 0x2d8   :  { %v1665_v52 = vpop.f32.mrb[6].mxu1 }
 0x2d9   :  { %v1273_v53 = vmax.f32 %v1665_v52, 0.0  ;;  %v1233_v54 = vpop.f32.mrb[7].mxu1 }
 0x2da   :  { %v1272_v58 = vmax.f32 %v1233_v54, 0.0 }
 0x2db   :  { %v1281_v59 = vmul.f32 %v1273_v53, %v1273_v53  ;;  %v1366_v60 = vmul.f32 %v2553_v16, %v1273_v53 }
 0x2dc   :  { %v1280_v61 = vmul.f32 %v1272_v58, %v1272_v58  ;;  %v1365_v63 = vmul.f32 %v2569_v28, %v1272_v58  ;;  %v1668_v2 = vpop.f32.mrb[8].mxu1 }
 0x2dd   :  { %v1289_v4 = vsel %vm649_vm2, %v1281_v59, 0.0  ;;  %v1374_v6 = vsel %vm649_vm2, %v1366_v60, 0.0  ;;  %v1275_v7 = vmax.f32 %v1668_v2, 0.0  ;;  %v1243_v10 = vpop.f32.mrb[9].mxu1 }
 0x2de   :  { %v1288_v14 = vsel %vm649_vm2, %v1280_v61, 0.0  ;;  %v1373_v23 = vsel %vm649_vm2, %v1365_v63, 0.0  ;;  %v1274_v24 = vmax.f32 %v1243_v10, 0.0 }
 0x2df   :  { %v1290_v16 = vadd.f32 %v1289_v4, %v1288_v14  ;;  %v1375_v25 = vadd.f32 %v1374_v6, %v1373_v23  ;;  %v1283_v0 = vmul.f32 %v1275_v7, %v1275_v7  ;;  %v1368_v28 = vmul.f32 %v2557_v55, %v1275_v7 }
 0x2e0   :  { %v1853_v26 = vpop.eup %1852  ;;  %v1282_v27 = vmul.f32 %v1274_v24, %v1274_v24  ;;  %v1367_v9 = vmul.f32 %v2555_v17, %v1274_v24  ;;  %v1671_v22 = vpop.f32.mrb[10].mxu1 }
 0x2e1   :  { %v1051_v56 = vmul.f32 %v1853_v26, %v1049_v12  ;;  %v1277_v30 = vmax.f32 %v1671_v22, 0.0  ;;  %v1253_v13 = vpop.f32.mrb[11].mxu1  ;;  %v1293_v31 = vsel %vm649_vm2, %v1283_v0, 0.0  ;;  %v1378_v55 = vsel %vm649_vm2, %v1368_v28, 0.0 }
 0x2e2   :  { %v1291_v8 = vsel %vm649_vm2, %v1282_v27, 0.0  ;;  %v1376_v32 = vsel %vm649_vm2, %v1367_v9, 0.0  ;;  %v1276_v33 = vmax.f32 %v1253_v13, 0.0 }
 0x2e3   :  { %v1062_v34 = vadd.f32 %v1061_v29, %v1051_v56  ;;  %v1292_v35 = vadd.f32 %v1291_v8, %v1290_v16  ;;  %v1377_v36 = vadd.f32 %v1376_v32, %v1375_v25  ;;  %v1285_v17 = vmul.f32 %v1277_v30, %v1277_v30 }
 0x2e4   :  { %v1370_v37 = vmul.f32 %v2561_v19, %v1277_v30  ;;  %v1284_v62 = vmul.f32 %v1276_v33, %v1276_v33  ;;  %v1369_v5 = vmul.f32 %v2559_v18, %v1276_v33  ;;  %v1674_v38 = vpop.f32.mrb[12].mxu1 }
 0x2e5   :  { %v1451_v39 = vmul.f32 -1.442695, %v1062_v34  ;;  %v1294_v40 = vadd.f32 %v1293_v31, %v1292_v35  ;;  %v1379_v41 = vadd.f32 %v1378_v55, %v1377_v36  ;;  %v1263_v42 = vpop.f32.mrb[13].mxu1  ;;  %v1279_v45 = vmax.f32 %v1674_v38, 0.0 }
 0x2e6   :  { %v1295_v43 = vsel %vm649_vm2, %v1284_v62, 0.0  ;;  %v1380_v44 = vsel %vm649_vm2, %v1369_v5, 0.0  ;;  %v1278_v48 = vmax.f32 %v1263_v42, 0.0  ;;  %v1297_v49 = vsel %vm649_vm2, %v1285_v17, 0.0 }
 0x2e7   :  { %1854 = vpow2.f32 %v1451_v39  ;;  %v1296_v46 = vadd.f32 %v1295_v43, %v1294_v40  ;;  %v1381_v47 = vadd.f32 %v1380_v44, %v1379_v41  ;;  %v1382_v19 = vsel %vm649_vm2, %v1370_v37, 0.0 }
 0x2e8   :  { %v1287_v50 = vmul.f32 %v1279_v45, %v1279_v45  ;;  %v1372_v18 = vmul.f32 %v2565_v21, %v1279_v45  ;;  %v1286_v51 = vmul.f32 %v1278_v48, %v1278_v48  ;;  %v1371_v53 = vmul.f32 %v2563_v20, %v1278_v48 }
 0x2e9   :  { %v1298_v52 = vadd.f32 %v1297_v49, %v1296_v46  ;;  %v1383_v54 = vadd.f32 %v1382_v19, %v1381_v47  ;;  %v1405_v31 = vrot.slane %v2567_v1, %v1060_v3 }
 0x2ea   :  { %v1299_v57 = vsel %vm649_vm2, %v1286_v51, 0.0  ;;  %v1384_v58 = vsel %vm649_vm2, %v1371_v53, 0.0  ;;  %v1301_v61 = vsel %vm649_vm2, %v1287_v50, 0.0  ;;  %v1386_v63 = vsel %vm649_vm2, %v1372_v18, 0.0 }
 0x2eb   :  { %v1300_v59 = vadd.f32 %v1299_v57, %v1298_v52  ;;  %v1385_v60 = vadd.f32 %v1384_v58, %v1383_v54 }
 0x2ed   :  { %v1302_v2 = vadd.f32 %v1301_v61, %v1300_v59  ;;  %v1387_v4 = vadd.f32 %v1386_v63, %v1385_v60 }
 0x2ef   :  { %v1303_v6 = vrot.slane %v1302_v2, 4  ;;  %v1388_v24 = vrot.slane %v1387_v4, 4 }
 0x2f1   :  { %v1855_v7 = vpop.eup %1854  ;;  %v1304_v21 = vadd.f32 %v1303_v6, %v1302_v2  ;;  %v1389_v25 = vadd.f32 %v1388_v24, %v1387_v4 }
 0x2f2   :  { %v1066_v10 = vadd.f32 1.0, %v1855_v7 }
 0x2f3   :  { %v1305_v11 = vrot.slane %v1304_v21, 2  ;;  %v1390_v9 = vrot.slane %v1389_v25, 2 }
 0x2f4   :  { %1856 = vrcp.f32 %v1066_v10 }
 0x2f5   :  { %v1306_v20 = vadd.f32 %v1305_v11, %v1304_v21  ;;  %v1391_v29 = vadd.f32 %v1390_v9, %v1389_v25 }
 0x2f7   :  { %v1307_v12 = vrot.slane %v1306_v20, 1  ;;  %v1392_v56 = vrot.slane %v1391_v29, 1 }
 0x2f9   :  { %v1308_v14 = vadd.f32 %v1307_v12, %v1306_v20  ;;  %v1393_v30 = vadd.f32 %v1392_v56, %v1391_v29 }
 0x2fb   :  { %1858 = vrsqrt.f32 %v1308_v14  ;;  %vm1311_vm2 = vcmp.eq.f32.partialorder %v1308_v14, inf  ;;  %v1314_v28 = vand.u32 2147483648, %v1308_v14  ;;  %vm1313_vm3 = vcmp.eq.f32.partialorder %v1308_v14, 0.0 }
 0x2fe   :  { %v1857_v23 = vpop.eup %1856 }
 0x2ff   :  { %1070 = vst.msk [vmem:[%s2648_s9] sm:$0x1] %vm1069_vm1, %v1857_v23 }
 0x305   :  { %v1859_v16 = vpop.eup %1858 }
 0x306   :  { %v1310_v0 = vmul.f32 %v1859_v16, %v1308_v14 }
 0x308   :  { %v1312_v26 = vsel %vm1311_vm2, %v1308_v14, %v1310_v0 }
 0x309   :  { %v1315_v27 = vsel %vm1313_vm3, %v1314_v28, %v1312_v26 }
 0x30a   :  { %v1316_v22 = vadd.f32 1e-06, %v1315_v27 }
 0x30c   :  { %1860 = vrcp.f32 %v1316_v22 }
 0x316   :  { %v1861_v13 = vpop.eup %1860 }
 0x317   :  { %v1395_v8 = vmul.f32 %v1861_v13, %v1393_v30 }
 0x319   :  { %v1406_v32 = vadd.f32 %v1405_v31, %v1395_v8 }
 0x31b   :  { %v1460_v33 = vmul.f32 -1.442695, %v1406_v32 }
 0x31d   :  { %1862 = vpow2.f32 %v1460_v33 }
 0x327   :  { %v1863_v34 = vpop.eup %1862 }
 0x328   :  { %v1410_v55 = vadd.f32 1.0, %v1863_v34 }
 0x32a   :  { %1864 = vrcp.f32 %v1410_v55 }
 0x32b   :  { %1877 = shalt.err (!%p1874_p4)
}
 0x32c   :  { %s1878_s8 = scalar_lea.hbm %s2649_s10, 32 }
 0x32d   :  { %p1879_p5 = scmp.ne.s32.totalorder %s2649_s10, %s1878_s8  ;;  %p1882_p6 = scmp.lt.u32.totalorder %s1878_s8, %s2649_s10 }
 0x32f   :  { %p1884_p7 = pnand %p1882_p6, %p1879_p5 }
 0x331   :  { %1887 = shalt.err (!%p1884_p7)
}
 0x332   :  { %1430 = dma.vmem_to_hbm [thread:$0]  %s1428_s0, 32, %s2649_s10, [#allocation6]   ;;  %vm1417_vm4 = vcmask 1040896  }
 0x334   :  { %v1865_v15 = vpop.eup %1864 }
 0x335   :  { %1414 = vrot.lane.b32.xlu1 %v1865_v15, %s1893_s12 }
 0x3a7   :  { %v1415_v1 = vpop.permute.xlu1 %1414 }
 0x3a8   :  { %1418 = vst.msk [vmem:[%s2648_s9] sm:$0x1] %vm1417_vm4, %v1415_v1 }
 0x3a9   :  { %1888 = dma.done.wait [#allocation6], 32  }
 0x3aa   :  { %1889 = vsyncadd [#allocation6], 4294967264 }
 0x3ab   :  { %1436 = vsyncpa [#allocation6], 1 }

</bundles_post_ra>
